<compile_context>
chip_gen: v5e
topology: v5e:2x2
jax: 0.10.0
libtpu: 0.0.40
codegen_flags: <defaults>
</compile_context>

<pallas_src>
import jax
import jax.numpy as jnp
from jax.experimental import pallas as pl
from jax.experimental.pallas import tpu as pltpu

# ------------------------- model config (small) -------------------------
VOCAB = 100
VOCAB_PAD = 128           # word_emb rows padded to 128 for a clean one-hot MXU gather
HIDDEN = 32
NUM_HEADS = 4
HEAD_DIM = HIDDEN // NUM_HEADS
FFN_DIM = 64
NUM_LAYERS = 2
NUM_LABELS = 3
LABELS_PAD = 128          # lane-dense padded classifier width (real labels in lanes [0:3])
MAX_POS = 16
LN_EPS = 1e-12

BATCH = 2
SEQ = 8


# ------------------------- fused Pallas kernel ---------------------------
def _layer_norm(x, g, b, eps=LN_EPS):
    mu = jnp.mean(x, axis=-1, keepdims=True)
    var = jnp.mean((x - mu) ** 2, axis=-1, keepdims=True)
    return (x - mu) * jax.lax.rsqrt(var + eps) * g + b


def _fused_model_kernel(
    ids_ref, mask_ref,
    word_emb_ref, pos_emb_ref, emb_ln_g_ref, emb_ln_b_ref,
    wqkv_ref, bqkv_ref, wo_ref, bo_ref, ln1_g_ref, ln1_b_ref,
    w1_ref, b1_ref, w2_ref, b2_ref, ln2_g_ref, ln2_b_ref,
    pool_w_ref, pool_b_ref, fc_w_ref, fc_b_ref,
    o_ref,
):
    B, S, H, nh, dh = BATCH, SEQ, HIDDEN, NUM_HEADS, HEAD_DIM
    BS = B * S
    scale = 1.0 / (dh ** 0.5)
    f32 = jnp.float32
    bf16 = jnp.bfloat16

    # ---- fused embedding: one-hot gather on the MXU + position add + LayerNorm ----
    ids_v = ids_ref[...]                                                 # (BS, 1) int32
    vocab_iota = jax.lax.broadcasted_iota(jnp.int32, (BS, VOCAB_PAD), 1)
    onehot = (ids_v == vocab_iota).astype(f32)                           # (BS, 128)
    word = jnp.dot(onehot, word_emb_ref[...], preferred_element_type=f32)  # (BS, H)
    pos = pos_emb_ref[0:S, :]                                            # (S, H) static slice
    pos_bs = jnp.concatenate([pos] * B, axis=0)                          # (BS, H)
    x = _layer_norm(word + pos_bs, emb_ln_g_ref[...], emb_ln_b_ref[...])

    # ---- key-padding mask bias, computed once and hoisted out of all loops ----
    mb = jnp.where(mask_ref[...] > 0, 0.0, -1e9).astype(f32)             # (B, S)
    mb = mb[:, None, :]                                                  # (B, 1, S)

    for l in range(NUM_LAYERS):                  # static unroll, weights stay in VMEM
        # ---- fused QKV projection: bf16 operands, f32 accumulation ----
        qkv = jnp.dot(x.astype(bf16), wqkv_ref[l],
                      preferred_element_type=f32) + bqkv_ref[l]          # (BS, 3H) f32

        # ---- per-head scores, stacked along sublanes -> ONE softmax stream ----
        scores = []
        for h in range(nh):
            qh = qkv[:, h * dh:(h + 1) * dh].reshape(B, S, dh)
            kh = qkv[:, H + h * dh:H + (h + 1) * dh].reshape(B, S, dh)
            scores.append(jnp.einsum('bqd,bkd->bqk', qh, kh,
                                     preferred_element_type=f32))        # (B, S, S)
        s = jnp.concatenate(scores, axis=1) * scale + mb                 # (B, nh*S, S)
        s = s - jnp.max(s, axis=-1, keepdims=True)
        p = jnp.exp(s)
        p = p * pl.reciprocal(jnp.sum(p, axis=-1, keepdims=True), approx=True)

        # ---- per-head context @ per-head output-projection rows (no lane concat) ----
        attn = None
        for h in range(nh):
            vh = qkv[:, 2 * H + h * dh:2 * H + (h + 1) * dh].reshape(B, S, dh)
            ph = p[:, h * S:(h + 1) * S, :]                              # (B, S, S)
            ctx = jnp.einsum('bqk,bkd->bqd', ph, vh,
                             preferred_element_type=f32).reshape(BS, dh)
            contrib = jnp.dot(ctx.astype(bf16), wo_ref[l * nh + h],
                              preferred_element_type=f32)                # (BS, H)
            attn = contrib if attn is None else attn + contrib
        attn = attn + bo_ref[l]
        x = _layer_norm(x + attn, ln1_g_ref[l], ln1_b_ref[l])

        # ---- FFN: GELU(x W1 + b1) W2 + b2, fused residual + LayerNorm ----
        hdn = jnp.dot(x.astype(bf16), w1_ref[l],
                      preferred_element_type=f32) + b1_ref[l]
        hdn = jax.nn.gelu(hdn)   # tanh-approx GELU (HF BERT default 'gelu' is erf; tiny diff)
        ffn = jnp.dot(hdn.astype(bf16), w2_ref[l],
                      preferred_element_type=f32) + b2_ref[l]
        x = _layer_norm(x + ffn, ln2_g_ref[l], ln2_b_ref[l])

    # ---- pooler (CLS token -> tanh) fused with the classifier ----
    cls = x.reshape(B, S, H)[:, 0:1, :].reshape(B, H)                    # (B, H) CLS rows
    pooled = jnp.tanh(jnp.dot(cls.astype(bf16), pool_w_ref[...],
                              preferred_element_type=f32) + pool_b_ref[...])
    # TODO(synk): nn.Dropout is identity in eval mode; training-mode dropout not implemented.
    logits = jnp.dot(pooled.astype(bf16), fc_w_ref[...],
                     preferred_element_type=f32) + fc_b_ref[...]         # (B, 128) lane-dense
    o_ref[...] = logits.astype(o_ref.dtype)


# ------------------------- parameter init -------------------------------
def init_params(key):
    def nrm(k, shape, scale=0.02, dtype=jnp.float32):
        return (scale * jax.random.normal(k, shape)).astype(dtype)

    keys = iter(jax.random.split(key, 64))
    L, H, F, nh, dh = NUM_LAYERS, HIDDEN, FFN_DIM, NUM_HEADS, HEAD_DIM
    bf16 = jnp.bfloat16
    params = {
        # word_emb padded to 128 rows (rows >= VOCAB are never selected by the one-hot)
        "word_emb": jnp.pad(nrm(next(keys), (VOCAB, H)),
                            ((0, VOCAB_PAD - VOCAB), (0, 0))),
        "pos_emb": nrm(next(keys), (MAX_POS, H)),
        "emb_ln_g": jnp.ones((1, H), jnp.float32),
        "emb_ln_b": jnp.zeros((1, H), jnp.float32),
        # per-layer params stacked over a leading layer axis; QKV fused into one weight.
        # Matmul weights stored bf16 (MXU-native operands), biases/LN params in f32.
        "wqkv": nrm(next(keys), (L, H, 3 * H), dtype=bf16),
        "bqkv": jnp.zeros((L, 1, 3 * H), jnp.float32),
        # output projection pre-split per head: rows of the (H, H) weight reshaped to
        # (nh, dh, H) and flattened over (layer, head) — free wrapper-side reordering
        # that removes the in-kernel concat of context heads.
        "wo": nrm(next(keys), (L * nh, dh, H), dtype=bf16),
        "bo": jnp.zeros((L, 1, H), jnp.float32),
        "ln1_g": jnp.ones((L, 1, H), jnp.float32),
        "ln1_b": jnp.zeros((L, 1, H), jnp.float32),
        "w1": nrm(next(keys), (L, H, F), dtype=bf16),
        "b1": jnp.zeros((L, 1, F), jnp.float32),
        "w2": nrm(next(keys), (L, F, H), dtype=bf16),
        "b2": jnp.zeros((L, 1, H), jnp.float32),
        "ln2_g": jnp.ones((L, 1, H), jnp.float32),
        "ln2_b": jnp.zeros((L, 1, H), jnp.float32),
        "pool_w": nrm(next(keys), (H, H), dtype=bf16),
        "pool_b": jnp.zeros((1, H), jnp.float32),
        # classifier padded to a lane-dense 128-wide output (zeros beyond NUM_LABELS)
        "fc_w": jnp.pad(nrm(next(keys), (H, NUM_LABELS)),
                        ((0, 0), (0, LABELS_PAD - NUM_LABELS))).astype(bf16),
        "fc_b": jnp.zeros((1, LABELS_PAD), jnp.float32),
    }
    return params


# ------------------------- forward pass ----------------------------------
@jax.jit
def my_model_forward(params, ids, mask):
    B, S = ids.shape

    # ids reshape is a metadata-only change; everything else runs inside ONE Pallas kernel.
    ids_flat = ids.reshape(B * S, 1).astype(jnp.int32)
    mask_i = mask.astype(jnp.int32)

    inputs = [
        ids_flat, mask_i,
        params["word_emb"], params["pos_emb"], params["emb_ln_g"], params["emb_ln_b"],
        params["wqkv"], params["bqkv"], params["wo"], params["bo"],
        params["ln1_g"], params["ln1_b"],
        params["w1"], params["b1"], params["w2"], params["b2"],
        params["ln2_g"], params["ln2_b"],
        params["pool_w"], params["pool_b"], params["fc_w"], params["fc_b"],
    ]

    def full_spec(a):
        nd = a.ndim
        return pl.BlockSpec(a.shape, lambda i, _nd=nd: (0,) * _nd)

    logits_pad = pl.pallas_call(
        _fused_model_kernel,
        out_shape=jax.ShapeDtypeStruct((B, LABELS_PAD), jnp.float32),
        grid=(1,),
        in_specs=[full_spec(a) for a in inputs],
        out_specs=pl.BlockSpec((B, LABELS_PAD), lambda i: (0, 0)),
        compiler_params=pltpu.CompilerParams(dimension_semantics=("arbitrary",)),
    )(*inputs)

    return logits_pad[:, :NUM_LABELS]


# ------------------------- main ------------------------------------------
if __name__ == "__main__":
    key = jax.random.PRNGKey(0)
    k_param, k_ids = jax.random.split(key)

    params = init_params(k_param)
    ids = jax.random.randint(k_ids, (BATCH, SEQ), 0, VOCAB, dtype=jnp.int32)
    # Attention mask: last 2 tokens of sample 1 padded.
    mask = jnp.ones((BATCH, SEQ), dtype=jnp.int32).at[1, -2:].set(0)

    logits = my_model_forward(params, ids, mask)
    jax.block_until_ready(logits)
    assert logits.shape == (BATCH, NUM_LABELS)
    print("KERNEL_OK")
</pallas_src>

<mosaic_0001>
module attributes {stable_mosaic.version = 11 : i64} {
  func.func @_fused_model_kernel(%arg0: i32, %arg1: memref<16x1xi32, #tpu.memory_space<vmem>>, %arg2: memref<2x8xi32, #tpu.memory_space<vmem>>, %arg3: memref<128x32xf32, #tpu.memory_space<vmem>>, %arg4: memref<16x32xf32, #tpu.memory_space<vmem>>, %arg5: memref<1x32xf32, #tpu.memory_space<vmem>>, %arg6: memref<1x32xf32, #tpu.memory_space<vmem>>, %arg7: memref<2x32x96xbf16, #tpu.memory_space<vmem>>, %arg8: memref<2x1x96xf32, #tpu.memory_space<vmem>>, %arg9: memref<8x8x32xbf16, #tpu.memory_space<vmem>>, %arg10: memref<2x1x32xf32, #tpu.memory_space<vmem>>, %arg11: memref<2x1x32xf32, #tpu.memory_space<vmem>>, %arg12: memref<2x1x32xf32, #tpu.memory_space<vmem>>, %arg13: memref<2x32x64xbf16, #tpu.memory_space<vmem>>, %arg14: memref<2x1x64xf32, #tpu.memory_space<vmem>>, %arg15: memref<2x64x32xbf16, #tpu.memory_space<vmem>>, %arg16: memref<2x1x32xf32, #tpu.memory_space<vmem>>, %arg17: memref<2x1x32xf32, #tpu.memory_space<vmem>>, %arg18: memref<2x1x32xf32, #tpu.memory_space<vmem>>, %arg19: memref<32x32xbf16, #tpu.memory_space<vmem>>, %arg20: memref<1x32xf32, #tpu.memory_space<vmem>>, %arg21: memref<32x128xbf16, #tpu.memory_space<vmem>>, %arg22: memref<1x128xf32, #tpu.memory_space<vmem>>, %arg23: memref<2x128xf32, #tpu.memory_space<vmem>>) attributes {dimension_semantics = [#tpu.dimension_semantics<arbitrary>], iteration_bounds = array<i64: 1>, scalar_prefetch = 0 : i64, scratch_operands = 0 : i64, tpu.core_type = #tpu.core_type<tc>, window_params = [{pipeline_mode = #tpu.pipeline_mode<synchronous>, transform_indices = @transform_0, window_bounds = array<i64: 16, 1>}, {pipeline_mode = #tpu.pipeline_mode<synchronous>, transform_indices = @transform_1, window_bounds = array<i64: 2, 8>}, {pipeline_mode = #tpu.pipeline_mode<synchronous>, transform_indices = @transform_2, window_bounds = array<i64: 128, 32>}, {pipeline_mode = #tpu.pipeline_mode<synchronous>, transform_indices = @transform_3, window_bounds = array<i64: 16, 32>}, {pipeline_mode = #tpu.pipeline_mode<synchronous>, transform_indices = @transform_4, window_bounds = array<i64: 1, 32>}, {pipeline_mode = #tpu.pipeline_mode<synchronous>, transform_indices = @transform_5, window_bounds = array<i64: 1, 32>}, {pipeline_mode = #tpu.pipeline_mode<synchronous>, transform_indices = @transform_6, window_bounds = array<i64: 2, 32, 96>}, {pipeline_mode = #tpu.pipeline_mode<synchronous>, transform_indices = @transform_7, window_bounds = array<i64: 2, 1, 96>}, {pipeline_mode = #tpu.pipeline_mode<synchronous>, transform_indices = @transform_8, window_bounds = array<i64: 8, 8, 32>}, {pipeline_mode = #tpu.pipeline_mode<synchronous>, transform_indices = @transform_9, window_bounds = array<i64: 2, 1, 32>}, {pipeline_mode = #tpu.pipeline_mode<synchronous>, transform_indices = @transform_10, window_bounds = array<i64: 2, 1, 32>}, {pipeline_mode = #tpu.pipeline_mode<synchronous>, transform_indices = @transform_11, window_bounds = array<i64: 2, 1, 32>}, {pipeline_mode = #tpu.pipeline_mode<synchronous>, transform_indices = @transform_12, window_bounds = array<i64: 2, 32, 64>}, {pipeline_mode = #tpu.pipeline_mode<synchronous>, transform_indices = @transform_13, window_bounds = array<i64: 2, 1, 64>}, {pipeline_mode = #tpu.pipeline_mode<synchronous>, transform_indices = @transform_14, window_bounds = array<i64: 2, 64, 32>}, {pipeline_mode = #tpu.pipeline_mode<synchronous>, transform_indices = @transform_15, window_bounds = array<i64: 2, 1, 32>}, {pipeline_mode = #tpu.pipeline_mode<synchronous>, transform_indices = @transform_16, window_bounds = array<i64: 2, 1, 32>}, {pipeline_mode = #tpu.pipeline_mode<synchronous>, transform_indices = @transform_17, window_bounds = array<i64: 2, 1, 32>}, {pipeline_mode = #tpu.pipeline_mode<synchronous>, transform_indices = @transform_18, window_bounds = array<i64: 32, 32>}, {pipeline_mode = #tpu.pipeline_mode<synchronous>, transform_indices = @transform_19, window_bounds = array<i64: 1, 32>}, {pipeline_mode = #tpu.pipeline_mode<synchronous>, transform_indices = @transform_20, window_bounds = array<i64: 32, 128>}, {pipeline_mode = #tpu.pipeline_mode<synchronous>, transform_indices = @transform_21, window_bounds = array<i64: 1, 128>}, {pipeline_mode = #tpu.pipeline_mode<synchronous>, transform_indices = @transform_22, window_bounds = array<i64: 2, 128>}]} {
    %c0 = arith.constant 0 : index
    %c0_0 = arith.constant 0 : index
    %0 = vector.load %arg1[%c0, %c0_0] : memref<16x1xi32, #tpu.memory_space<vmem>>, vector<16x1xi32>
    %1 = tpu.iota {dimensions = array<i32: 1>} : vector<16x128xi32>
    %2 = vector.broadcast %0 : vector<16x1xi32> to vector<16x128xi32>
    %3 = arith.cmpi eq, %2, %1 : vector<16x128xi32>
    %4 = arith.extui %3 : vector<16x128xi1> to vector<16x128xi32>
    %5 = arith.sitofp %4 : vector<16x128xi32> to vector<16x128xf32>
    %c0_1 = arith.constant 0 : index
    %c0_2 = arith.constant 0 : index
    %6 = vector.load %arg3[%c0_1, %c0_2] : memref<128x32xf32, #tpu.memory_space<vmem>>, vector<128x32xf32>
    %cst = arith.constant dense<0.000000e+00> : vector<16x32xf32>
    %7 = tpu.matmul %5, %6, %cst {dimension_numbers = #tpu.dot_dimension_numbers<[1], [0], [0], [1], [0, 0, 1, 1], [], []>} : vector<16x128xf32>, vector<128x32xf32>, vector<16x32xf32> -> vector<16x32xf32>
    %c0_3 = arith.constant 0 : index
    %c0_4 = arith.constant 0 : index
    %8 = vector.load %arg4[%c0_3, %c0_4] : memref<16x32xf32, #tpu.memory_space<vmem>>, vector<8x32xf32>
    %9 = tpu.concatenate %8, %8 in 0 : vector<8x32xf32>, vector<8x32xf32> -> vector<16x32xf32>
    %10 = arith.addf %7, %9 : vector<16x32xf32>
    %c0_5 = arith.constant 0 : index
    %c0_6 = arith.constant 0 : index
    %11 = vector.load %arg5[%c0_5, %c0_6] : memref<1x32xf32, #tpu.memory_space<vmem>>, vector<1x32xf32>
    %c0_7 = arith.constant 0 : index
    %c0_8 = arith.constant 0 : index
    %12 = vector.load %arg6[%c0_7, %c0_8] : memref<1x32xf32, #tpu.memory_space<vmem>>, vector<1x32xf32>
    %cst_9 = arith.constant dense<0.000000e+00> : vector<16xf32>
    %13 = vector.multi_reduction <add>, %10, %cst_9 [1] : vector<16x32xf32> to vector<16xf32>
    %14 = vector.shape_cast %13 : vector<16xf32> to vector<16x1xf32>
    %cst_10 = arith.constant 3.200000e+01 : f32
    %15 = vector.broadcast %cst_10 : f32 to vector<16x1xf32>
    %16 = arith.divf %14, %15 : vector<16x1xf32>
    %17 = vector.broadcast %16 : vector<16x1xf32> to vector<16x32xf32>
    %18 = arith.subf %10, %17 : vector<16x32xf32>
    %19 = arith.mulf %18, %18 : vector<16x32xf32>
    %cst_11 = arith.constant dense<0.000000e+00> : vector<16xf32>
    %20 = vector.multi_reduction <add>, %19, %cst_11 [1] : vector<16x32xf32> to vector<16xf32>
    %21 = vector.shape_cast %20 : vector<16xf32> to vector<16x1xf32>
    %cst_12 = arith.constant 3.200000e+01 : f32
    %22 = vector.broadcast %cst_12 : f32 to vector<16x1xf32>
    %23 = arith.divf %21, %22 : vector<16x1xf32>
    %24 = vector.broadcast %16 : vector<16x1xf32> to vector<16x32xf32>
    %25 = arith.subf %10, %24 : vector<16x32xf32>
    %cst_13 = arith.constant 9.99999996E-13 : f32
    %26 = vector.broadcast %cst_13 : f32 to vector<16x1xf32>
    %27 = arith.addf %23, %26 : vector<16x1xf32>
    %28 = math.rsqrt %27 : vector<16x1xf32>
    %29 = vector.broadcast %28 : vector<16x1xf32> to vector<16x32xf32>
    %30 = arith.mulf %25, %29 : vector<16x32xf32>
    %31 = vector.broadcast %11 : vector<1x32xf32> to vector<16x32xf32>
    %32 = arith.mulf %30, %31 : vector<16x32xf32>
    %33 = vector.broadcast %12 : vector<1x32xf32> to vector<16x32xf32>
    %34 = arith.addf %32, %33 : vector<16x32xf32>
    %c0_14 = arith.constant 0 : index
    %c0_15 = arith.constant 0 : index
    %35 = vector.load %arg2[%c0_14, %c0_15] : memref<2x8xi32, #tpu.memory_space<vmem>>, vector<2x8xi32>
    %c0_i32 = arith.constant 0 : i32
    %36 = vector.broadcast %c0_i32 : i32 to vector<2x8xi32>
    %37 = arith.cmpi sgt, %35, %36 : vector<2x8xi32>
    %cst_16 = arith.constant 0.000000e+00 : f32
    %cst_17 = arith.constant -1.000000e+09 : f32
    %38 = vector.broadcast %cst_16 : f32 to vector<2x8xf32>
    %39 = vector.broadcast %cst_17 : f32 to vector<2x8xf32>
    %40 = arith.select %37, %38, %39 : vector<2x8xi1>, vector<2x8xf32>
    %41 = vector.shape_cast %40 : vector<2x8xf32> to vector<2x1x8xf32>
    %42 = arith.truncf %34 : vector<16x32xf32> to vector<16x32xbf16>
    %c0_18 = arith.constant 0 : index
    %c0_19 = arith.constant 0 : index
    %c0_20 = arith.constant 0 : index
    %43 = vector.load %arg7[%c0_18, %c0_19, %c0_20] : memref<2x32x96xbf16, #tpu.memory_space<vmem>>, vector<1x32x96xbf16>
    %44 = vector.shape_cast %43 : vector<1x32x96xbf16> to vector<32x96xbf16>
    %cst_21 = arith.constant dense<0.000000e+00> : vector<16x96xf32>
    %45 = tpu.matmul %42, %44, %cst_21 {dimension_numbers = #tpu.dot_dimension_numbers<[1], [0], [0], [1], [0, 0, 1, 1], [], []>} : vector<16x32xbf16>, vector<32x96xbf16>, vector<16x96xf32> -> vector<16x96xf32>
    %c0_22 = arith.constant 0 : index
    %c0_23 = arith.constant 0 : index
    %c0_24 = arith.constant 0 : index
    %46 = vector.load %arg8[%c0_22, %c0_23, %c0_24] : memref<2x1x96xf32, #tpu.memory_space<vmem>>, vector<1x1x96xf32>
    %47 = vector.shape_cast %46 : vector<1x1x96xf32> to vector<1x96xf32>
    %48 = vector.broadcast %47 : vector<1x96xf32> to vector<16x96xf32>
    %49 = arith.addf %45, %48 : vector<16x96xf32>
    %50 = vector.extract_strided_slice %49 {offsets = [0, 0], sizes = [16, 8], strides = [1, 1]} : vector<16x96xf32> to vector<16x8xf32>
    %51 = vector.shape_cast %50 : vector<16x8xf32> to vector<2x8x8xf32>
    %52 = vector.extract_strided_slice %49 {offsets = [0, 32], sizes = [16, 8], strides = [1, 1]} : vector<16x96xf32> to vector<16x8xf32>
    %53 = vector.shape_cast %52 : vector<16x8xf32> to vector<2x8x8xf32>
    "tpu.trace_start"() <{level = 10 : i32, message = "bqd,bkd->bqk"}> : () -> ()
    %cst_25 = arith.constant dense<0.000000e+00> : vector<2x8x8xf32>
    %54 = tpu.matmul %51, %53, %cst_25 {dimension_numbers = #tpu.dot_dimension_numbers<[2], [2], [1], [1], [0, 0, 0, 1, 1, 1], [0], [0]>} : vector<2x8x8xf32>, vector<2x8x8xf32>, vector<2x8x8xf32> -> vector<2x8x8xf32>
    "tpu.trace_stop"() : () -> ()
    %55 = vector.extract_strided_slice %49 {offsets = [0, 8], sizes = [16, 8], strides = [1, 1]} : vector<16x96xf32> to vector<16x8xf32>
    %56 = vector.shape_cast %55 : vector<16x8xf32> to vector<2x8x8xf32>
    %57 = vector.extract_strided_slice %49 {offsets = [0, 40], sizes = [16, 8], strides = [1, 1]} : vector<16x96xf32> to vector<16x8xf32>
    %58 = vector.shape_cast %57 : vector<16x8xf32> to vector<2x8x8xf32>
    "tpu.trace_start"() <{level = 10 : i32, message = "bqd,bkd->bqk"}> : () -> ()
    %cst_26 = arith.constant dense<0.000000e+00> : vector<2x8x8xf32>
    %59 = tpu.matmul %56, %58, %cst_26 {dimension_numbers = #tpu.dot_dimension_numbers<[2], [2], [1], [1], [0, 0, 0, 1, 1, 1], [0], [0]>} : vector<2x8x8xf32>, vector<2x8x8xf32>, vector<2x8x8xf32> -> vector<2x8x8xf32>
    "tpu.trace_stop"() : () -> ()
    %60 = vector.extract_strided_slice %49 {offsets = [0, 16], sizes = [16, 8], strides = [1, 1]} : vector<16x96xf32> to vector<16x8xf32>
    %61 = vector.shape_cast %60 : vector<16x8xf32> to vector<2x8x8xf32>
    %62 = vector.extract_strided_slice %49 {offsets = [0, 48], sizes = [16, 8], strides = [1, 1]} : vector<16x96xf32> to vector<16x8xf32>
    %63 = vector.shape_cast %62 : vector<16x8xf32> to vector<2x8x8xf32>
    "tpu.trace_start"() <{level = 10 : i32, message = "bqd,bkd->bqk"}> : () -> ()
    %cst_27 = arith.constant dense<0.000000e+00> : vector<2x8x8xf32>
    %64 = tpu.matmul %61, %63, %cst_27 {dimension_numbers = #tpu.dot_dimension_numbers<[2], [2], [1], [1], [0, 0, 0, 1, 1, 1], [0], [0]>} : vector<2x8x8xf32>, vector<2x8x8xf32>, vector<2x8x8xf32> -> vector<2x8x8xf32>
    "tpu.trace_stop"() : () -> ()
    %65 = vector.extract_strided_slice %49 {offsets = [0, 24], sizes = [16, 8], strides = [1, 1]} : vector<16x96xf32> to vector<16x8xf32>
    %66 = vector.shape_cast %65 : vector<16x8xf32> to vector<2x8x8xf32>
    %67 = vector.extract_strided_slice %49 {offsets = [0, 56], sizes = [16, 8], strides = [1, 1]} : vector<16x96xf32> to vector<16x8xf32>
    %68 = vector.shape_cast %67 : vector<16x8xf32> to vector<2x8x8xf32>
    "tpu.trace_start"() <{level = 10 : i32, message = "bqd,bkd->bqk"}> : () -> ()
    %cst_28 = arith.constant dense<0.000000e+00> : vector<2x8x8xf32>
    %69 = tpu.matmul %66, %68, %cst_28 {dimension_numbers = #tpu.dot_dimension_numbers<[2], [2], [1], [1], [0, 0, 0, 1, 1, 1], [0], [0]>} : vector<2x8x8xf32>, vector<2x8x8xf32>, vector<2x8x8xf32> -> vector<2x8x8xf32>
    "tpu.trace_stop"() : () -> ()
    %70 = tpu.concatenate %54, %59, %64, %69 in 1 : vector<2x8x8xf32>, vector<2x8x8xf32>, vector<2x8x8xf32>, vector<2x8x8xf32> -> vector<2x32x8xf32>
    %cst_29 = arith.constant 0.353553385 : f32
    %71 = vector.broadcast %cst_29 : f32 to vector<2x32x8xf32>
    %72 = arith.mulf %70, %71 : vector<2x32x8xf32>
    %73 = vector.broadcast %41 : vector<2x1x8xf32> to vector<2x32x8xf32>
    %74 = arith.addf %72, %73 : vector<2x32x8xf32>
    %cst_30 = arith.constant dense<0xFF800000> : vector<2x32xf32>
    %75 = vector.multi_reduction <maximumf>, %74, %cst_30 [2] : vector<2x32x8xf32> to vector<2x32xf32>
    %76 = vector.shape_cast %75 : vector<2x32xf32> to vector<2x32x1xf32>
    %77 = vector.broadcast %76 : vector<2x32x1xf32> to vector<2x32x8xf32>
    %78 = arith.subf %74, %77 : vector<2x32x8xf32>
    %79 = math.exp %78 : vector<2x32x8xf32>
    %cst_31 = arith.constant dense<0.000000e+00> : vector<2x32xf32>
    %80 = vector.multi_reduction <add>, %79, %cst_31 [2] : vector<2x32x8xf32> to vector<2x32xf32>
    %81 = vector.shape_cast %80 : vector<2x32xf32> to vector<2x32x1xf32>
    %82 = tpu.reciprocal %81 {approx = true} : vector<2x32x1xf32> -> vector<2x32x1xf32>
    %83 = vector.broadcast %82 : vector<2x32x1xf32> to vector<2x32x8xf32>
    %84 = arith.mulf %79, %83 : vector<2x32x8xf32>
    %85 = vector.extract_strided_slice %49 {offsets = [0, 64], sizes = [16, 8], strides = [1, 1]} : vector<16x96xf32> to vector<16x8xf32>
    %86 = vector.shape_cast %85 : vector<16x8xf32> to vector<2x8x8xf32>
    %87 = vector.extract_strided_slice %84 {offsets = [0, 0, 0], sizes = [2, 8, 8], strides = [1, 1, 1]} : vector<2x32x8xf32> to vector<2x8x8xf32>
    "tpu.trace_start"() <{level = 10 : i32, message = "bqk,bkd->bqd"}> : () -> ()
    %cst_32 = arith.constant dense<0.000000e+00> : vector<2x8x8xf32>
    %88 = tpu.matmul %87, %86, %cst_32 {dimension_numbers = #tpu.dot_dimension_numbers<[2], [1], [1], [2], [0, 0, 0, 1, 1, 2], [0], [0]>} : vector<2x8x8xf32>, vector<2x8x8xf32>, vector<2x8x8xf32> -> vector<2x8x8xf32>
    "tpu.trace_stop"() : () -> ()
    %89 = vector.shape_cast %88 : vector<2x8x8xf32> to vector<16x8xf32>
    %90 = arith.truncf %89 : vector<16x8xf32> to vector<16x8xbf16>
    %c0_33 = arith.constant 0 : index
    %c0_34 = arith.constant 0 : index
    %c0_35 = arith.constant 0 : index
    %91 = vector.load %arg9[%c0_33, %c0_34, %c0_35] : memref<8x8x32xbf16, #tpu.memory_space<vmem>>, vector<1x8x32xbf16>
    %92 = vector.shape_cast %91 : vector<1x8x32xbf16> to vector<8x32xbf16>
    %cst_36 = arith.constant dense<0.000000e+00> : vector<16x32xf32>
    %93 = tpu.matmul %90, %92, %cst_36 {dimension_numbers = #tpu.dot_dimension_numbers<[1], [0], [0], [1], [0, 0, 1, 1], [], []>} : vector<16x8xbf16>, vector<8x32xbf16>, vector<16x32xf32> -> vector<16x32xf32>
    %94 = vector.extract_strided_slice %49 {offsets = [0, 72], sizes = [16, 8], strides = [1, 1]} : vector<16x96xf32> to vector<16x8xf32>
    %95 = vector.shape_cast %94 : vector<16x8xf32> to vector<2x8x8xf32>
    %96 = vector.extract_strided_slice %84 {offsets = [0, 8, 0], sizes = [2, 8, 8], strides = [1, 1, 1]} : vector<2x32x8xf32> to vector<2x8x8xf32>
    "tpu.trace_start"() <{level = 10 : i32, message = "bqk,bkd->bqd"}> : () -> ()
    %cst_37 = arith.constant dense<0.000000e+00> : vector<2x8x8xf32>
    %97 = tpu.matmul %96, %95, %cst_37 {dimension_numbers = #tpu.dot_dimension_numbers<[2], [1], [1], [2], [0, 0, 0, 1, 1, 2], [0], [0]>} : vector<2x8x8xf32>, vector<2x8x8xf32>, vector<2x8x8xf32> -> vector<2x8x8xf32>
    "tpu.trace_stop"() : () -> ()
    %98 = vector.shape_cast %97 : vector<2x8x8xf32> to vector<16x8xf32>
    %99 = arith.truncf %98 : vector<16x8xf32> to vector<16x8xbf16>
    %c1 = arith.constant 1 : index
    %c0_38 = arith.constant 0 : index
    %c0_39 = arith.constant 0 : index
    %100 = vector.load %arg9[%c1, %c0_38, %c0_39] : memref<8x8x32xbf16, #tpu.memory_space<vmem>>, vector<1x8x32xbf16>
    %101 = vector.shape_cast %100 : vector<1x8x32xbf16> to vector<8x32xbf16>
    %cst_40 = arith.constant dense<0.000000e+00> : vector<16x32xf32>
    %102 = tpu.matmul %99, %101, %cst_40 {dimension_numbers = #tpu.dot_dimension_numbers<[1], [0], [0], [1], [0, 0, 1, 1], [], []>} : vector<16x8xbf16>, vector<8x32xbf16>, vector<16x32xf32> -> vector<16x32xf32>
    %103 = arith.addf %93, %102 : vector<16x32xf32>
    %104 = vector.extract_strided_slice %49 {offsets = [0, 80], sizes = [16, 8], strides = [1, 1]} : vector<16x96xf32> to vector<16x8xf32>
    %105 = vector.shape_cast %104 : vector<16x8xf32> to vector<2x8x8xf32>
    %106 = vector.extract_strided_slice %84 {offsets = [0, 16, 0], sizes = [2, 8, 8], strides = [1, 1, 1]} : vector<2x32x8xf32> to vector<2x8x8xf32>
    "tpu.trace_start"() <{level = 10 : i32, message = "bqk,bkd->bqd"}> : () -> ()
    %cst_41 = arith.constant dense<0.000000e+00> : vector<2x8x8xf32>
    %107 = tpu.matmul %106, %105, %cst_41 {dimension_numbers = #tpu.dot_dimension_numbers<[2], [1], [1], [2], [0, 0, 0, 1, 1, 2], [0], [0]>} : vector<2x8x8xf32>, vector<2x8x8xf32>, vector<2x8x8xf32> -> vector<2x8x8xf32>
    "tpu.trace_stop"() : () -> ()
    %108 = vector.shape_cast %107 : vector<2x8x8xf32> to vector<16x8xf32>
    %109 = arith.truncf %108 : vector<16x8xf32> to vector<16x8xbf16>
    %c2 = arith.constant 2 : index
    %c0_42 = arith.constant 0 : index
    %c0_43 = arith.constant 0 : index
    %110 = vector.load %arg9[%c2, %c0_42, %c0_43] : memref<8x8x32xbf16, #tpu.memory_space<vmem>>, vector<1x8x32xbf16>
    %111 = vector.shape_cast %110 : vector<1x8x32xbf16> to vector<8x32xbf16>
    %cst_44 = arith.constant dense<0.000000e+00> : vector<16x32xf32>
    %112 = tpu.matmul %109, %111, %cst_44 {dimension_numbers = #tpu.dot_dimension_numbers<[1], [0], [0], [1], [0, 0, 1, 1], [], []>} : vector<16x8xbf16>, vector<8x32xbf16>, vector<16x32xf32> -> vector<16x32xf32>
    %113 = arith.addf %103, %112 : vector<16x32xf32>
    %114 = vector.extract_strided_slice %49 {offsets = [0, 88], sizes = [16, 8], strides = [1, 1]} : vector<16x96xf32> to vector<16x8xf32>
    %115 = vector.shape_cast %114 : vector<16x8xf32> to vector<2x8x8xf32>
    %116 = vector.extract_strided_slice %84 {offsets = [0, 24, 0], sizes = [2, 8, 8], strides = [1, 1, 1]} : vector<2x32x8xf32> to vector<2x8x8xf32>
    "tpu.trace_start"() <{level = 10 : i32, message = "bqk,bkd->bqd"}> : () -> ()
    %cst_45 = arith.constant dense<0.000000e+00> : vector<2x8x8xf32>
    %117 = tpu.matmul %116, %115, %cst_45 {dimension_numbers = #tpu.dot_dimension_numbers<[2], [1], [1], [2], [0, 0, 0, 1, 1, 2], [0], [0]>} : vector<2x8x8xf32>, vector<2x8x8xf32>, vector<2x8x8xf32> -> vector<2x8x8xf32>
    "tpu.trace_stop"() : () -> ()
    %118 = vector.shape_cast %117 : vector<2x8x8xf32> to vector<16x8xf32>
    %119 = arith.truncf %118 : vector<16x8xf32> to vector<16x8xbf16>
    %c3 = arith.constant 3 : index
    %c0_46 = arith.constant 0 : index
    %c0_47 = arith.constant 0 : index
    %120 = vector.load %arg9[%c3, %c0_46, %c0_47] : memref<8x8x32xbf16, #tpu.memory_space<vmem>>, vector<1x8x32xbf16>
    %121 = vector.shape_cast %120 : vector<1x8x32xbf16> to vector<8x32xbf16>
    %cst_48 = arith.constant dense<0.000000e+00> : vector<16x32xf32>
    %122 = tpu.matmul %119, %121, %cst_48 {dimension_numbers = #tpu.dot_dimension_numbers<[1], [0], [0], [1], [0, 0, 1, 1], [], []>} : vector<16x8xbf16>, vector<8x32xbf16>, vector<16x32xf32> -> vector<16x32xf32>
    %123 = arith.addf %113, %122 : vector<16x32xf32>
    %c0_49 = arith.constant 0 : index
    %c0_50 = arith.constant 0 : index
    %c0_51 = arith.constant 0 : index
    %124 = vector.load %arg10[%c0_49, %c0_50, %c0_51] : memref<2x1x32xf32, #tpu.memory_space<vmem>>, vector<1x1x32xf32>
    %125 = vector.shape_cast %124 : vector<1x1x32xf32> to vector<1x32xf32>
    %126 = vector.broadcast %125 : vector<1x32xf32> to vector<16x32xf32>
    %127 = arith.addf %123, %126 : vector<16x32xf32>
    %128 = arith.addf %34, %127 : vector<16x32xf32>
    %c0_52 = arith.constant 0 : index
    %c0_53 = arith.constant 0 : index
    %c0_54 = arith.constant 0 : index
    %129 = vector.load %arg11[%c0_52, %c0_53, %c0_54] : memref<2x1x32xf32, #tpu.memory_space<vmem>>, vector<1x1x32xf32>
    %130 = vector.shape_cast %129 : vector<1x1x32xf32> to vector<1x32xf32>
    %c0_55 = arith.constant 0 : index
    %c0_56 = arith.constant 0 : index
    %c0_57 = arith.constant 0 : index
    %131 = vector.load %arg12[%c0_55, %c0_56, %c0_57] : memref<2x1x32xf32, #tpu.memory_space<vmem>>, vector<1x1x32xf32>
    %132 = vector.shape_cast %131 : vector<1x1x32xf32> to vector<1x32xf32>
    %cst_58 = arith.constant dense<0.000000e+00> : vector<16xf32>
    %133 = vector.multi_reduction <add>, %128, %cst_58 [1] : vector<16x32xf32> to vector<16xf32>
    %134 = vector.shape_cast %133 : vector<16xf32> to vector<16x1xf32>
    %cst_59 = arith.constant 3.200000e+01 : f32
    %135 = vector.broadcast %cst_59 : f32 to vector<16x1xf32>
    %136 = arith.divf %134, %135 : vector<16x1xf32>
    %137 = vector.broadcast %136 : vector<16x1xf32> to vector<16x32xf32>
    %138 = arith.subf %128, %137 : vector<16x32xf32>
    %139 = arith.mulf %138, %138 : vector<16x32xf32>
    %cst_60 = arith.constant dense<0.000000e+00> : vector<16xf32>
    %140 = vector.multi_reduction <add>, %139, %cst_60 [1] : vector<16x32xf32> to vector<16xf32>
    %141 = vector.shape_cast %140 : vector<16xf32> to vector<16x1xf32>
    %cst_61 = arith.constant 3.200000e+01 : f32
    %142 = vector.broadcast %cst_61 : f32 to vector<16x1xf32>
    %143 = arith.divf %141, %142 : vector<16x1xf32>
    %144 = vector.broadcast %136 : vector<16x1xf32> to vector<16x32xf32>
    %145 = arith.subf %128, %144 : vector<16x32xf32>
    %cst_62 = arith.constant 9.99999996E-13 : f32
    %146 = vector.broadcast %cst_62 : f32 to vector<16x1xf32>
    %147 = arith.addf %143, %146 : vector<16x1xf32>
    %148 = math.rsqrt %147 : vector<16x1xf32>
    %149 = vector.broadcast %148 : vector<16x1xf32> to vector<16x32xf32>
    %150 = arith.mulf %145, %149 : vector<16x32xf32>
    %151 = vector.broadcast %130 : vector<1x32xf32> to vector<16x32xf32>
    %152 = arith.mulf %150, %151 : vector<16x32xf32>
    %153 = vector.broadcast %132 : vector<1x32xf32> to vector<16x32xf32>
    %154 = arith.addf %152, %153 : vector<16x32xf32>
    %155 = arith.truncf %154 : vector<16x32xf32> to vector<16x32xbf16>
    %c0_63 = arith.constant 0 : index
    %c0_64 = arith.constant 0 : index
    %c0_65 = arith.constant 0 : index
    %156 = vector.load %arg13[%c0_63, %c0_64, %c0_65] : memref<2x32x64xbf16, #tpu.memory_space<vmem>>, vector<1x32x64xbf16>
    %157 = vector.shape_cast %156 : vector<1x32x64xbf16> to vector<32x64xbf16>
    %cst_66 = arith.constant dense<0.000000e+00> : vector<16x64xf32>
    %158 = tpu.matmul %155, %157, %cst_66 {dimension_numbers = #tpu.dot_dimension_numbers<[1], [0], [0], [1], [0, 0, 1, 1], [], []>} : vector<16x32xbf16>, vector<32x64xbf16>, vector<16x64xf32> -> vector<16x64xf32>
    %c0_67 = arith.constant 0 : index
    %c0_68 = arith.constant 0 : index
    %c0_69 = arith.constant 0 : index
    %159 = vector.load %arg14[%c0_67, %c0_68, %c0_69] : memref<2x1x64xf32, #tpu.memory_space<vmem>>, vector<1x1x64xf32>
    %160 = vector.shape_cast %159 : vector<1x1x64xf32> to vector<1x64xf32>
    %161 = vector.broadcast %160 : vector<1x64xf32> to vector<16x64xf32>
    %162 = arith.addf %158, %161 : vector<16x64xf32>
    %163 = arith.mulf %162, %162 : vector<16x64xf32>
    %164 = arith.mulf %162, %163 : vector<16x64xf32>
    %cst_70 = arith.constant 4.471500e-02 : f32
    %165 = vector.broadcast %cst_70 : f32 to vector<16x64xf32>
    %166 = arith.mulf %165, %164 : vector<16x64xf32>
    %167 = arith.addf %162, %166 : vector<16x64xf32>
    %cst_71 = arith.constant 0.797884583 : f32
    %168 = vector.broadcast %cst_71 : f32 to vector<16x64xf32>
    %169 = arith.mulf %168, %167 : vector<16x64xf32>
    %170 = math.tanh %169 : vector<16x64xf32>
    %cst_72 = arith.constant 1.000000e+00 : f32
    %171 = vector.broadcast %cst_72 : f32 to vector<16x64xf32>
    %172 = arith.addf %171, %170 : vector<16x64xf32>
    %cst_73 = arith.constant 5.000000e-01 : f32
    %173 = vector.broadcast %cst_73 : f32 to vector<16x64xf32>
    %174 = arith.mulf %173, %172 : vector<16x64xf32>
    %175 = arith.mulf %162, %174 : vector<16x64xf32>
    %176 = arith.truncf %175 : vector<16x64xf32> to vector<16x64xbf16>
    %c0_74 = arith.constant 0 : index
    %c0_75 = arith.constant 0 : index
    %c0_76 = arith.constant 0 : index
    %177 = vector.load %arg15[%c0_74, %c0_75, %c0_76] : memref<2x64x32xbf16, #tpu.memory_space<vmem>>, vector<1x64x32xbf16>
    %178 = vector.shape_cast %177 : vector<1x64x32xbf16> to vector<64x32xbf16>
    %cst_77 = arith.constant dense<0.000000e+00> : vector<16x32xf32>
    %179 = tpu.matmul %176, %178, %cst_77 {dimension_numbers = #tpu.dot_dimension_numbers<[1], [0], [0], [1], [0, 0, 1, 1], [], []>} : vector<16x64xbf16>, vector<64x32xbf16>, vector<16x32xf32> -> vector<16x32xf32>
    %c0_78 = arith.constant 0 : index
    %c0_79 = arith.constant 0 : index
    %c0_80 = arith.constant 0 : index
    %180 = vector.load %arg16[%c0_78, %c0_79, %c0_80] : memref<2x1x32xf32, #tpu.memory_space<vmem>>, vector<1x1x32xf32>
    %181 = vector.shape_cast %180 : vector<1x1x32xf32> to vector<1x32xf32>
    %182 = vector.broadcast %181 : vector<1x32xf32> to vector<16x32xf32>
    %183 = arith.addf %179, %182 : vector<16x32xf32>
    %184 = arith.addf %154, %183 : vector<16x32xf32>
    %c0_81 = arith.constant 0 : index
    %c0_82 = arith.constant 0 : index
    %c0_83 = arith.constant 0 : index
    %185 = vector.load %arg17[%c0_81, %c0_82, %c0_83] : memref<2x1x32xf32, #tpu.memory_space<vmem>>, vector<1x1x32xf32>
    %186 = vector.shape_cast %185 : vector<1x1x32xf32> to vector<1x32xf32>
    %c0_84 = arith.constant 0 : index
    %c0_85 = arith.constant 0 : index
    %c0_86 = arith.constant 0 : index
    %187 = vector.load %arg18[%c0_84, %c0_85, %c0_86] : memref<2x1x32xf32, #tpu.memory_space<vmem>>, vector<1x1x32xf32>
    %188 = vector.shape_cast %187 : vector<1x1x32xf32> to vector<1x32xf32>
    %cst_87 = arith.constant dense<0.000000e+00> : vector<16xf32>
    %189 = vector.multi_reduction <add>, %184, %cst_87 [1] : vector<16x32xf32> to vector<16xf32>
    %190 = vector.shape_cast %189 : vector<16xf32> to vector<16x1xf32>
    %cst_88 = arith.constant 3.200000e+01 : f32
    %191 = vector.broadcast %cst_88 : f32 to vector<16x1xf32>
    %192 = arith.divf %190, %191 : vector<16x1xf32>
    %193 = vector.broadcast %192 : vector<16x1xf32> to vector<16x32xf32>
    %194 = arith.subf %184, %193 : vector<16x32xf32>
    %195 = arith.mulf %194, %194 : vector<16x32xf32>
    %cst_89 = arith.constant dense<0.000000e+00> : vector<16xf32>
    %196 = vector.multi_reduction <add>, %195, %cst_89 [1] : vector<16x32xf32> to vector<16xf32>
    %197 = vector.shape_cast %196 : vector<16xf32> to vector<16x1xf32>
    %cst_90 = arith.constant 3.200000e+01 : f32
    %198 = vector.broadcast %cst_90 : f32 to vector<16x1xf32>
    %199 = arith.divf %197, %198 : vector<16x1xf32>
    %200 = vector.broadcast %192 : vector<16x1xf32> to vector<16x32xf32>
    %201 = arith.subf %184, %200 : vector<16x32xf32>
    %cst_91 = arith.constant 9.99999996E-13 : f32
    %202 = vector.broadcast %cst_91 : f32 to vector<16x1xf32>
    %203 = arith.addf %199, %202 : vector<16x1xf32>
    %204 = math.rsqrt %203 : vector<16x1xf32>
    %205 = vector.broadcast %204 : vector<16x1xf32> to vector<16x32xf32>
    %206 = arith.mulf %201, %205 : vector<16x32xf32>
    %207 = vector.broadcast %186 : vector<1x32xf32> to vector<16x32xf32>
    %208 = arith.mulf %206, %207 : vector<16x32xf32>
    %209 = vector.broadcast %188 : vector<1x32xf32> to vector<16x32xf32>
    %210 = arith.addf %208, %209 : vector<16x32xf32>
    %211 = arith.truncf %210 : vector<16x32xf32> to vector<16x32xbf16>
    %c1_92 = arith.constant 1 : index
    %c0_93 = arith.constant 0 : index
    %c0_94 = arith.constant 0 : index
    %212 = vector.load %arg7[%c1_92, %c0_93, %c0_94] : memref<2x32x96xbf16, #tpu.memory_space<vmem>>, vector<1x32x96xbf16>
    %213 = vector.shape_cast %212 : vector<1x32x96xbf16> to vector<32x96xbf16>
    %cst_95 = arith.constant dense<0.000000e+00> : vector<16x96xf32>
    %214 = tpu.matmul %211, %213, %cst_95 {dimension_numbers = #tpu.dot_dimension_numbers<[1], [0], [0], [1], [0, 0, 1, 1], [], []>} : vector<16x32xbf16>, vector<32x96xbf16>, vector<16x96xf32> -> vector<16x96xf32>
    %c1_96 = arith.constant 1 : index
    %c0_97 = arith.constant 0 : index
    %c0_98 = arith.constant 0 : index
    %215 = vector.load %arg8[%c1_96, %c0_97, %c0_98] : memref<2x1x96xf32, #tpu.memory_space<vmem>>, vector<1x1x96xf32>
    %216 = vector.shape_cast %215 : vector<1x1x96xf32> to vector<1x96xf32>
    %217 = vector.broadcast %216 : vector<1x96xf32> to vector<16x96xf32>
    %218 = arith.addf %214, %217 : vector<16x96xf32>
    %219 = vector.extract_strided_slice %218 {offsets = [0, 0], sizes = [16, 8], strides = [1, 1]} : vector<16x96xf32> to vector<16x8xf32>
    %220 = vector.shape_cast %219 : vector<16x8xf32> to vector<2x8x8xf32>
    %221 = vector.extract_strided_slice %218 {offsets = [0, 32], sizes = [16, 8], strides = [1, 1]} : vector<16x96xf32> to vector<16x8xf32>
    %222 = vector.shape_cast %221 : vector<16x8xf32> to vector<2x8x8xf32>
    "tpu.trace_start"() <{level = 10 : i32, message = "bqd,bkd->bqk"}> : () -> ()
    %cst_99 = arith.constant dense<0.000000e+00> : vector<2x8x8xf32>
    %223 = tpu.matmul %220, %222, %cst_99 {dimension_numbers = #tpu.dot_dimension_numbers<[2], [2], [1], [1], [0, 0, 0, 1, 1, 1], [0], [0]>} : vector<2x8x8xf32>, vector<2x8x8xf32>, vector<2x8x8xf32> -> vector<2x8x8xf32>
    "tpu.trace_stop"() : () -> ()
    %224 = vector.extract_strided_slice %218 {offsets = [0, 8], sizes = [16, 8], strides = [1, 1]} : vector<16x96xf32> to vector<16x8xf32>
    %225 = vector.shape_cast %224 : vector<16x8xf32> to vector<2x8x8xf32>
    %226 = vector.extract_strided_slice %218 {offsets = [0, 40], sizes = [16, 8], strides = [1, 1]} : vector<16x96xf32> to vector<16x8xf32>
    %227 = vector.shape_cast %226 : vector<16x8xf32> to vector<2x8x8xf32>
    "tpu.trace_start"() <{level = 10 : i32, message = "bqd,bkd->bqk"}> : () -> ()
    %cst_100 = arith.constant dense<0.000000e+00> : vector<2x8x8xf32>
    %228 = tpu.matmul %225, %227, %cst_100 {dimension_numbers = #tpu.dot_dimension_numbers<[2], [2], [1], [1], [0, 0, 0, 1, 1, 1], [0], [0]>} : vector<2x8x8xf32>, vector<2x8x8xf32>, vector<2x8x8xf32> -> vector<2x8x8xf32>
    "tpu.trace_stop"() : () -> ()
    %229 = vector.extract_strided_slice %218 {offsets = [0, 16], sizes = [16, 8], strides = [1, 1]} : vector<16x96xf32> to vector<16x8xf32>
    %230 = vector.shape_cast %229 : vector<16x8xf32> to vector<2x8x8xf32>
    %231 = vector.extract_strided_slice %218 {offsets = [0, 48], sizes = [16, 8], strides = [1, 1]} : vector<16x96xf32> to vector<16x8xf32>
    %232 = vector.shape_cast %231 : vector<16x8xf32> to vector<2x8x8xf32>
    "tpu.trace_start"() <{level = 10 : i32, message = "bqd,bkd->bqk"}> : () -> ()
    %cst_101 = arith.constant dense<0.000000e+00> : vector<2x8x8xf32>
    %233 = tpu.matmul %230, %232, %cst_101 {dimension_numbers = #tpu.dot_dimension_numbers<[2], [2], [1], [1], [0, 0, 0, 1, 1, 1], [0], [0]>} : vector<2x8x8xf32>, vector<2x8x8xf32>, vector<2x8x8xf32> -> vector<2x8x8xf32>
    "tpu.trace_stop"() : () -> ()
    %234 = vector.extract_strided_slice %218 {offsets = [0, 24], sizes = [16, 8], strides = [1, 1]} : vector<16x96xf32> to vector<16x8xf32>
    %235 = vector.shape_cast %234 : vector<16x8xf32> to vector<2x8x8xf32>
    %236 = vector.extract_strided_slice %218 {offsets = [0, 56], sizes = [16, 8], strides = [1, 1]} : vector<16x96xf32> to vector<16x8xf32>
    %237 = vector.shape_cast %236 : vector<16x8xf32> to vector<2x8x8xf32>
    "tpu.trace_start"() <{level = 10 : i32, message = "bqd,bkd->bqk"}> : () -> ()
    %cst_102 = arith.constant dense<0.000000e+00> : vector<2x8x8xf32>
    %238 = tpu.matmul %235, %237, %cst_102 {dimension_numbers = #tpu.dot_dimension_numbers<[2], [2], [1], [1], [0, 0, 0, 1, 1, 1], [0], [0]>} : vector<2x8x8xf32>, vector<2x8x8xf32>, vector<2x8x8xf32> -> vector<2x8x8xf32>
    "tpu.trace_stop"() : () -> ()
    %239 = tpu.concatenate %223, %228, %233, %238 in 1 : vector<2x8x8xf32>, vector<2x8x8xf32>, vector<2x8x8xf32>, vector<2x8x8xf32> -> vector<2x32x8xf32>
    %cst_103 = arith.constant 0.353553385 : f32
    %240 = vector.broadcast %cst_103 : f32 to vector<2x32x8xf32>
    %241 = arith.mulf %239, %240 : vector<2x32x8xf32>
    %242 = vector.broadcast %41 : vector<2x1x8xf32> to vector<2x32x8xf32>
    %243 = arith.addf %241, %242 : vector<2x32x8xf32>
    %cst_104 = arith.constant dense<0xFF800000> : vector<2x32xf32>
    %244 = vector.multi_reduction <maximumf>, %243, %cst_104 [2] : vector<2x32x8xf32> to vector<2x32xf32>
    %245 = vector.shape_cast %244 : vector<2x32xf32> to vector<2x32x1xf32>
    %246 = vector.broadcast %245 : vector<2x32x1xf32> to vector<2x32x8xf32>
    %247 = arith.subf %243, %246 : vector<2x32x8xf32>
    %248 = math.exp %247 : vector<2x32x8xf32>
    %cst_105 = arith.constant dense<0.000000e+00> : vector<2x32xf32>
    %249 = vector.multi_reduction <add>, %248, %cst_105 [2] : vector<2x32x8xf32> to vector<2x32xf32>
    %250 = vector.shape_cast %249 : vector<2x32xf32> to vector<2x32x1xf32>
    %251 = tpu.reciprocal %250 {approx = true} : vector<2x32x1xf32> -> vector<2x32x1xf32>
    %252 = vector.broadcast %251 : vector<2x32x1xf32> to vector<2x32x8xf32>
    %253 = arith.mulf %248, %252 : vector<2x32x8xf32>
    %254 = vector.extract_strided_slice %218 {offsets = [0, 64], sizes = [16, 8], strides = [1, 1]} : vector<16x96xf32> to vector<16x8xf32>
    %255 = vector.shape_cast %254 : vector<16x8xf32> to vector<2x8x8xf32>
    %256 = vector.extract_strided_slice %253 {offsets = [0, 0, 0], sizes = [2, 8, 8], strides = [1, 1, 1]} : vector<2x32x8xf32> to vector<2x8x8xf32>
    "tpu.trace_start"() <{level = 10 : i32, message = "bqk,bkd->bqd"}> : () -> ()
    %cst_106 = arith.constant dense<0.000000e+00> : vector<2x8x8xf32>
    %257 = tpu.matmul %256, %255, %cst_106 {dimension_numbers = #tpu.dot_dimension_numbers<[2], [1], [1], [2], [0, 0, 0, 1, 1, 2], [0], [0]>} : vector<2x8x8xf32>, vector<2x8x8xf32>, vector<2x8x8xf32> -> vector<2x8x8xf32>
    "tpu.trace_stop"() : () -> ()
    %258 = vector.shape_cast %257 : vector<2x8x8xf32> to vector<16x8xf32>
    %259 = arith.truncf %258 : vector<16x8xf32> to vector<16x8xbf16>
    %c4 = arith.constant 4 : index
    %c0_107 = arith.constant 0 : index
    %c0_108 = arith.constant 0 : index
    %260 = vector.load %arg9[%c4, %c0_107, %c0_108] : memref<8x8x32xbf16, #tpu.memory_space<vmem>>, vector<1x8x32xbf16>
    %261 = vector.shape_cast %260 : vector<1x8x32xbf16> to vector<8x32xbf16>
    %cst_109 = arith.constant dense<0.000000e+00> : vector<16x32xf32>
    %262 = tpu.matmul %259, %261, %cst_109 {dimension_numbers = #tpu.dot_dimension_numbers<[1], [0], [0], [1], [0, 0, 1, 1], [], []>} : vector<16x8xbf16>, vector<8x32xbf16>, vector<16x32xf32> -> vector<16x32xf32>
    %263 = vector.extract_strided_slice %218 {offsets = [0, 72], sizes = [16, 8], strides = [1, 1]} : vector<16x96xf32> to vector<16x8xf32>
    %264 = vector.shape_cast %263 : vector<16x8xf32> to vector<2x8x8xf32>
    %265 = vector.extract_strided_slice %253 {offsets = [0, 8, 0], sizes = [2, 8, 8], strides = [1, 1, 1]} : vector<2x32x8xf32> to vector<2x8x8xf32>
    "tpu.trace_start"() <{level = 10 : i32, message = "bqk,bkd->bqd"}> : () -> ()
    %cst_110 = arith.constant dense<0.000000e+00> : vector<2x8x8xf32>
    %266 = tpu.matmul %265, %264, %cst_110 {dimension_numbers = #tpu.dot_dimension_numbers<[2], [1], [1], [2], [0, 0, 0, 1, 1, 2], [0], [0]>} : vector<2x8x8xf32>, vector<2x8x8xf32>, vector<2x8x8xf32> -> vector<2x8x8xf32>
    "tpu.trace_stop"() : () -> ()
    %267 = vector.shape_cast %266 : vector<2x8x8xf32> to vector<16x8xf32>
    %268 = arith.truncf %267 : vector<16x8xf32> to vector<16x8xbf16>
    %c5 = arith.constant 5 : index
    %c0_111 = arith.constant 0 : index
    %c0_112 = arith.constant 0 : index
    %269 = vector.load %arg9[%c5, %c0_111, %c0_112] : memref<8x8x32xbf16, #tpu.memory_space<vmem>>, vector<1x8x32xbf16>
    %270 = vector.shape_cast %269 : vector<1x8x32xbf16> to vector<8x32xbf16>
    %cst_113 = arith.constant dense<0.000000e+00> : vector<16x32xf32>
    %271 = tpu.matmul %268, %270, %cst_113 {dimension_numbers = #tpu.dot_dimension_numbers<[1], [0], [0], [1], [0, 0, 1, 1], [], []>} : vector<16x8xbf16>, vector<8x32xbf16>, vector<16x32xf32> -> vector<16x32xf32>
    %272 = arith.addf %262, %271 : vector<16x32xf32>
    %273 = vector.extract_strided_slice %218 {offsets = [0, 80], sizes = [16, 8], strides = [1, 1]} : vector<16x96xf32> to vector<16x8xf32>
    %274 = vector.shape_cast %273 : vector<16x8xf32> to vector<2x8x8xf32>
    %275 = vector.extract_strided_slice %253 {offsets = [0, 16, 0], sizes = [2, 8, 8], strides = [1, 1, 1]} : vector<2x32x8xf32> to vector<2x8x8xf32>
    "tpu.trace_start"() <{level = 10 : i32, message = "bqk,bkd->bqd"}> : () -> ()
    %cst_114 = arith.constant dense<0.000000e+00> : vector<2x8x8xf32>
    %276 = tpu.matmul %275, %274, %cst_114 {dimension_numbers = #tpu.dot_dimension_numbers<[2], [1], [1], [2], [0, 0, 0, 1, 1, 2], [0], [0]>} : vector<2x8x8xf32>, vector<2x8x8xf32>, vector<2x8x8xf32> -> vector<2x8x8xf32>
    "tpu.trace_stop"() : () -> ()
    %277 = vector.shape_cast %276 : vector<2x8x8xf32> to vector<16x8xf32>
    %278 = arith.truncf %277 : vector<16x8xf32> to vector<16x8xbf16>
    %c6 = arith.constant 6 : index
    %c0_115 = arith.constant 0 : index
    %c0_116 = arith.constant 0 : index
    %279 = vector.load %arg9[%c6, %c0_115, %c0_116] : memref<8x8x32xbf16, #tpu.memory_space<vmem>>, vector<1x8x32xbf16>
    %280 = vector.shape_cast %279 : vector<1x8x32xbf16> to vector<8x32xbf16>
    %cst_117 = arith.constant dense<0.000000e+00> : vector<16x32xf32>
    %281 = tpu.matmul %278, %280, %cst_117 {dimension_numbers = #tpu.dot_dimension_numbers<[1], [0], [0], [1], [0, 0, 1, 1], [], []>} : vector<16x8xbf16>, vector<8x32xbf16>, vector<16x32xf32> -> vector<16x32xf32>
    %282 = arith.addf %272, %281 : vector<16x32xf32>
    %283 = vector.extract_strided_slice %218 {offsets = [0, 88], sizes = [16, 8], strides = [1, 1]} : vector<16x96xf32> to vector<16x8xf32>
    %284 = vector.shape_cast %283 : vector<16x8xf32> to vector<2x8x8xf32>
    %285 = vector.extract_strided_slice %253 {offsets = [0, 24, 0], sizes = [2, 8, 8], strides = [1, 1, 1]} : vector<2x32x8xf32> to vector<2x8x8xf32>
    "tpu.trace_start"() <{level = 10 : i32, message = "bqk,bkd->bqd"}> : () -> ()
    %cst_118 = arith.constant dense<0.000000e+00> : vector<2x8x8xf32>
    %286 = tpu.matmul %285, %284, %cst_118 {dimension_numbers = #tpu.dot_dimension_numbers<[2], [1], [1], [2], [0, 0, 0, 1, 1, 2], [0], [0]>} : vector<2x8x8xf32>, vector<2x8x8xf32>, vector<2x8x8xf32> -> vector<2x8x8xf32>
    "tpu.trace_stop"() : () -> ()
    %287 = vector.shape_cast %286 : vector<2x8x8xf32> to vector<16x8xf32>
    %288 = arith.truncf %287 : vector<16x8xf32> to vector<16x8xbf16>
    %c7 = arith.constant 7 : index
    %c0_119 = arith.constant 0 : index
    %c0_120 = arith.constant 0 : index
    %289 = vector.load %arg9[%c7, %c0_119, %c0_120] : memref<8x8x32xbf16, #tpu.memory_space<vmem>>, vector<1x8x32xbf16>
    %290 = vector.shape_cast %289 : vector<1x8x32xbf16> to vector<8x32xbf16>
    %cst_121 = arith.constant dense<0.000000e+00> : vector<16x32xf32>
    %291 = tpu.matmul %288, %290, %cst_121 {dimension_numbers = #tpu.dot_dimension_numbers<[1], [0], [0], [1], [0, 0, 1, 1], [], []>} : vector<16x8xbf16>, vector<8x32xbf16>, vector<16x32xf32> -> vector<16x32xf32>
    %292 = arith.addf %282, %291 : vector<16x32xf32>
    %c1_122 = arith.constant 1 : index
    %c0_123 = arith.constant 0 : index
    %c0_124 = arith.constant 0 : index
    %293 = vector.load %arg10[%c1_122, %c0_123, %c0_124] : memref<2x1x32xf32, #tpu.memory_space<vmem>>, vector<1x1x32xf32>
    %294 = vector.shape_cast %293 : vector<1x1x32xf32> to vector<1x32xf32>
    %295 = vector.broadcast %294 : vector<1x32xf32> to vector<16x32xf32>
    %296 = arith.addf %292, %295 : vector<16x32xf32>
    %297 = arith.addf %210, %296 : vector<16x32xf32>
    %c1_125 = arith.constant 1 : index
    %c0_126 = arith.constant 0 : index
    %c0_127 = arith.constant 0 : index
    %298 = vector.load %arg11[%c1_125, %c0_126, %c0_127] : memref<2x1x32xf32, #tpu.memory_space<vmem>>, vector<1x1x32xf32>
    %299 = vector.shape_cast %298 : vector<1x1x32xf32> to vector<1x32xf32>
    %c1_128 = arith.constant 1 : index
    %c0_129 = arith.constant 0 : index
    %c0_130 = arith.constant 0 : index
    %300 = vector.load %arg12[%c1_128, %c0_129, %c0_130] : memref<2x1x32xf32, #tpu.memory_space<vmem>>, vector<1x1x32xf32>
    %301 = vector.shape_cast %300 : vector<1x1x32xf32> to vector<1x32xf32>
    %cst_131 = arith.constant dense<0.000000e+00> : vector<16xf32>
    %302 = vector.multi_reduction <add>, %297, %cst_131 [1] : vector<16x32xf32> to vector<16xf32>
    %303 = vector.shape_cast %302 : vector<16xf32> to vector<16x1xf32>
    %cst_132 = arith.constant 3.200000e+01 : f32
    %304 = vector.broadcast %cst_132 : f32 to vector<16x1xf32>
    %305 = arith.divf %303, %304 : vector<16x1xf32>
    %306 = vector.broadcast %305 : vector<16x1xf32> to vector<16x32xf32>
    %307 = arith.subf %297, %306 : vector<16x32xf32>
    %308 = arith.mulf %307, %307 : vector<16x32xf32>
    %cst_133 = arith.constant dense<0.000000e+00> : vector<16xf32>
    %309 = vector.multi_reduction <add>, %308, %cst_133 [1] : vector<16x32xf32> to vector<16xf32>
    %310 = vector.shape_cast %309 : vector<16xf32> to vector<16x1xf32>
    %cst_134 = arith.constant 3.200000e+01 : f32
    %311 = vector.broadcast %cst_134 : f32 to vector<16x1xf32>
    %312 = arith.divf %310, %311 : vector<16x1xf32>
    %313 = vector.broadcast %305 : vector<16x1xf32> to vector<16x32xf32>
    %314 = arith.subf %297, %313 : vector<16x32xf32>
    %cst_135 = arith.constant 9.99999996E-13 : f32
    %315 = vector.broadcast %cst_135 : f32 to vector<16x1xf32>
    %316 = arith.addf %312, %315 : vector<16x1xf32>
    %317 = math.rsqrt %316 : vector<16x1xf32>
    %318 = vector.broadcast %317 : vector<16x1xf32> to vector<16x32xf32>
    %319 = arith.mulf %314, %318 : vector<16x32xf32>
    %320 = vector.broadcast %299 : vector<1x32xf32> to vector<16x32xf32>
    %321 = arith.mulf %319, %320 : vector<16x32xf32>
    %322 = vector.broadcast %301 : vector<1x32xf32> to vector<16x32xf32>
    %323 = arith.addf %321, %322 : vector<16x32xf32>
    %324 = arith.truncf %323 : vector<16x32xf32> to vector<16x32xbf16>
    %c1_136 = arith.constant 1 : index
    %c0_137 = arith.constant 0 : index
    %c0_138 = arith.constant 0 : index
    %325 = vector.load %arg13[%c1_136, %c0_137, %c0_138] : memref<2x32x64xbf16, #tpu.memory_space<vmem>>, vector<1x32x64xbf16>
    %326 = vector.shape_cast %325 : vector<1x32x64xbf16> to vector<32x64xbf16>
    %cst_139 = arith.constant dense<0.000000e+00> : vector<16x64xf32>
    %327 = tpu.matmul %324, %326, %cst_139 {dimension_numbers = #tpu.dot_dimension_numbers<[1], [0], [0], [1], [0, 0, 1, 1], [], []>} : vector<16x32xbf16>, vector<32x64xbf16>, vector<16x64xf32> -> vector<16x64xf32>
    %c1_140 = arith.constant 1 : index
    %c0_141 = arith.constant 0 : index
    %c0_142 = arith.constant 0 : index
    %328 = vector.load %arg14[%c1_140, %c0_141, %c0_142] : memref<2x1x64xf32, #tpu.memory_space<vmem>>, vector<1x1x64xf32>
    %329 = vector.shape_cast %328 : vector<1x1x64xf32> to vector<1x64xf32>
    %330 = vector.broadcast %329 : vector<1x64xf32> to vector<16x64xf32>
    %331 = arith.addf %327, %330 : vector<16x64xf32>
    %332 = arith.mulf %331, %331 : vector<16x64xf32>
    %333 = arith.mulf %331, %332 : vector<16x64xf32>
    %cst_143 = arith.constant 4.471500e-02 : f32
    %334 = vector.broadcast %cst_143 : f32 to vector<16x64xf32>
    %335 = arith.mulf %334, %333 : vector<16x64xf32>
    %336 = arith.addf %331, %335 : vector<16x64xf32>
    %cst_144 = arith.constant 0.797884583 : f32
    %337 = vector.broadcast %cst_144 : f32 to vector<16x64xf32>
    %338 = arith.mulf %337, %336 : vector<16x64xf32>
    %339 = math.tanh %338 : vector<16x64xf32>
    %cst_145 = arith.constant 1.000000e+00 : f32
    %340 = vector.broadcast %cst_145 : f32 to vector<16x64xf32>
    %341 = arith.addf %340, %339 : vector<16x64xf32>
    %cst_146 = arith.constant 5.000000e-01 : f32
    %342 = vector.broadcast %cst_146 : f32 to vector<16x64xf32>
    %343 = arith.mulf %342, %341 : vector<16x64xf32>
    %344 = arith.mulf %331, %343 : vector<16x64xf32>
    %345 = arith.truncf %344 : vector<16x64xf32> to vector<16x64xbf16>
    %c1_147 = arith.constant 1 : index
    %c0_148 = arith.constant 0 : index
    %c0_149 = arith.constant 0 : index
    %346 = vector.load %arg15[%c1_147, %c0_148, %c0_149] : memref<2x64x32xbf16, #tpu.memory_space<vmem>>, vector<1x64x32xbf16>
    %347 = vector.shape_cast %346 : vector<1x64x32xbf16> to vector<64x32xbf16>
    %cst_150 = arith.constant dense<0.000000e+00> : vector<16x32xf32>
    %348 = tpu.matmul %345, %347, %cst_150 {dimension_numbers = #tpu.dot_dimension_numbers<[1], [0], [0], [1], [0, 0, 1, 1], [], []>} : vector<16x64xbf16>, vector<64x32xbf16>, vector<16x32xf32> -> vector<16x32xf32>
    %c1_151 = arith.constant 1 : index
    %c0_152 = arith.constant 0 : index
    %c0_153 = arith.constant 0 : index
    %349 = vector.load %arg16[%c1_151, %c0_152, %c0_153] : memref<2x1x32xf32, #tpu.memory_space<vmem>>, vector<1x1x32xf32>
    %350 = vector.shape_cast %349 : vector<1x1x32xf32> to vector<1x32xf32>
    %351 = vector.broadcast %350 : vector<1x32xf32> to vector<16x32xf32>
    %352 = arith.addf %348, %351 : vector<16x32xf32>
    %353 = arith.addf %323, %352 : vector<16x32xf32>
    %c1_154 = arith.constant 1 : index
    %c0_155 = arith.constant 0 : index
    %c0_156 = arith.constant 0 : index
    %354 = vector.load %arg17[%c1_154, %c0_155, %c0_156] : memref<2x1x32xf32, #tpu.memory_space<vmem>>, vector<1x1x32xf32>
    %355 = vector.shape_cast %354 : vector<1x1x32xf32> to vector<1x32xf32>
    %c1_157 = arith.constant 1 : index
    %c0_158 = arith.constant 0 : index
    %c0_159 = arith.constant 0 : index
    %356 = vector.load %arg18[%c1_157, %c0_158, %c0_159] : memref<2x1x32xf32, #tpu.memory_space<vmem>>, vector<1x1x32xf32>
    %357 = vector.shape_cast %356 : vector<1x1x32xf32> to vector<1x32xf32>
    %cst_160 = arith.constant dense<0.000000e+00> : vector<16xf32>
    %358 = vector.multi_reduction <add>, %353, %cst_160 [1] : vector<16x32xf32> to vector<16xf32>
    %359 = vector.shape_cast %358 : vector<16xf32> to vector<16x1xf32>
    %cst_161 = arith.constant 3.200000e+01 : f32
    %360 = vector.broadcast %cst_161 : f32 to vector<16x1xf32>
    %361 = arith.divf %359, %360 : vector<16x1xf32>
    %362 = vector.broadcast %361 : vector<16x1xf32> to vector<16x32xf32>
    %363 = arith.subf %353, %362 : vector<16x32xf32>
    %364 = arith.mulf %363, %363 : vector<16x32xf32>
    %cst_162 = arith.constant dense<0.000000e+00> : vector<16xf32>
    %365 = vector.multi_reduction <add>, %364, %cst_162 [1] : vector<16x32xf32> to vector<16xf32>
    %366 = vector.shape_cast %365 : vector<16xf32> to vector<16x1xf32>
    %cst_163 = arith.constant 3.200000e+01 : f32
    %367 = vector.broadcast %cst_163 : f32 to vector<16x1xf32>
    %368 = arith.divf %366, %367 : vector<16x1xf32>
    %369 = vector.broadcast %361 : vector<16x1xf32> to vector<16x32xf32>
    %370 = arith.subf %353, %369 : vector<16x32xf32>
    %cst_164 = arith.constant 9.99999996E-13 : f32
    %371 = vector.broadcast %cst_164 : f32 to vector<16x1xf32>
    %372 = arith.addf %368, %371 : vector<16x1xf32>
    %373 = math.rsqrt %372 : vector<16x1xf32>
    %374 = vector.broadcast %373 : vector<16x1xf32> to vector<16x32xf32>
    %375 = arith.mulf %370, %374 : vector<16x32xf32>
    %376 = vector.broadcast %355 : vector<1x32xf32> to vector<16x32xf32>
    %377 = arith.mulf %375, %376 : vector<16x32xf32>
    %378 = vector.broadcast %357 : vector<1x32xf32> to vector<16x32xf32>
    %379 = arith.addf %377, %378 : vector<16x32xf32>
    %380 = vector.shape_cast %379 : vector<16x32xf32> to vector<2x8x32xf32>
    %381 = vector.extract_strided_slice %380 {offsets = [0, 0, 0], sizes = [2, 1, 32], strides = [1, 1, 1]} : vector<2x8x32xf32> to vector<2x1x32xf32>
    %382 = vector.shape_cast %381 : vector<2x1x32xf32> to vector<2x32xf32>
    %383 = arith.truncf %382 : vector<2x32xf32> to vector<2x32xbf16>
    %c0_165 = arith.constant 0 : index
    %c0_166 = arith.constant 0 : index
    %384 = vector.load %arg19[%c0_165, %c0_166] : memref<32x32xbf16, #tpu.memory_space<vmem>>, vector<32x32xbf16>
    %cst_167 = arith.constant dense<0.000000e+00> : vector<2x32xf32>
    %385 = tpu.matmul %383, %384, %cst_167 {dimension_numbers = #tpu.dot_dimension_numbers<[1], [0], [0], [1], [0, 0, 1, 1], [], []>} : vector<2x32xbf16>, vector<32x32xbf16>, vector<2x32xf32> -> vector<2x32xf32>
    %c0_168 = arith.constant 0 : index
    %c0_169 = arith.constant 0 : index
    %386 = vector.load %arg20[%c0_168, %c0_169] : memref<1x32xf32, #tpu.memory_space<vmem>>, vector<1x32xf32>
    %387 = vector.broadcast %386 : vector<1x32xf32> to vector<2x32xf32>
    %388 = arith.addf %385, %387 : vector<2x32xf32>
    %389 = math.tanh %388 : vector<2x32xf32>
    %390 = arith.truncf %389 : vector<2x32xf32> to vector<2x32xbf16>
    %c0_170 = arith.constant 0 : index
    %c0_171 = arith.constant 0 : index
    %391 = vector.load %arg21[%c0_170, %c0_171] : memref<32x128xbf16, #tpu.memory_space<vmem>>, vector<32x128xbf16>
    %cst_172 = arith.constant dense<0.000000e+00> : vector<2x128xf32>
    %392 = tpu.matmul %390, %391, %cst_172 {dimension_numbers = #tpu.dot_dimension_numbers<[1], [0], [0], [1], [0, 0, 1, 1], [], []>} : vector<2x32xbf16>, vector<32x128xbf16>, vector<2x128xf32> -> vector<2x128xf32>
    %c0_173 = arith.constant 0 : index
    %c0_174 = arith.constant 0 : index
    %393 = vector.load %arg22[%c0_173, %c0_174] : memref<1x128xf32, #tpu.memory_space<vmem>>, vector<1x128xf32>
    %394 = vector.broadcast %393 : vector<1x128xf32> to vector<2x128xf32>
    %395 = arith.addf %392, %394 : vector<2x128xf32>
    %c0_175 = arith.constant 0 : index
    %c0_176 = arith.constant 0 : index
    %396 = vector.load %arg23[%c0_175, %c0_176] : memref<2x128xf32, #tpu.memory_space<vmem>>, vector<2x128xf32>
    tpu.vector_store %arg23[%c0_175, %c0_176], %395 {strides = array<i32>} : memref<2x128xf32, #tpu.memory_space<vmem>>, vector<2x128xf32>,
    return
  }
  func.func @transform_0(%arg0: i32) -> (i32, i32) {
    %c0_i32 = arith.constant 0 : i32
    %c0_i32_0 = arith.constant 0 : i32
    %c0_i32_1 = arith.constant 0 : i32
    return %c0_i32, %c0_i32_0 : i32, i32
  }
  func.func @transform_1(%arg0: i32) -> (i32, i32) {
    %c0_i32 = arith.constant 0 : i32
    %c0_i32_0 = arith.constant 0 : i32
    %c0_i32_1 = arith.constant 0 : i32
    return %c0_i32, %c0_i32_0 : i32, i32
  }
  func.func @transform_2(%arg0: i32) -> (i32, i32) {
    %c0_i32 = arith.constant 0 : i32
    %c0_i32_0 = arith.constant 0 : i32
    %c0_i32_1 = arith.constant 0 : i32
    return %c0_i32, %c0_i32_0 : i32, i32
  }
  func.func @transform_3(%arg0: i32) -> (i32, i32) {
    %c0_i32 = arith.constant 0 : i32
    %c0_i32_0 = arith.constant 0 : i32
    %c0_i32_1 = arith.constant 0 : i32
    return %c0_i32, %c0_i32_0 : i32, i32
  }
  func.func @transform_4(%arg0: i32) -> (i32, i32) {
    %c0_i32 = arith.constant 0 : i32
    %c0_i32_0 = arith.constant 0 : i32
    %c0_i32_1 = arith.constant 0 : i32
    return %c0_i32, %c0_i32_0 : i32, i32
  }
  func.func @transform_5(%arg0: i32) -> (i32, i32) {
    %c0_i32 = arith.constant 0 : i32
    %c0_i32_0 = arith.constant 0 : i32
    %c0_i32_1 = arith.constant 0 : i32
    return %c0_i32, %c0_i32_0 : i32, i32
  }
  func.func @transform_6(%arg0: i32) -> (i32, i32, i32) {
    %c0_i32 = arith.constant 0 : i32
    %c0_i32_0 = arith.constant 0 : i32
    %c0_i32_1 = arith.constant 0 : i32
    %c0_i32_2 = arith.constant 0 : i32
    return %c0_i32, %c0_i32_0, %c0_i32_1 : i32, i32, i32
  }
  func.func @transform_7(%arg0: i32) -> (i32, i32, i32) {
    %c0_i32 = arith.constant 0 : i32
    %c0_i32_0 = arith.constant 0 : i32
    %c0_i32_1 = arith.constant 0 : i32
    %c0_i32_2 = arith.constant 0 : i32
    return %c0_i32, %c0_i32_0, %c0_i32_1 : i32, i32, i32
  }
  func.func @transform_8(%arg0: i32) -> (i32, i32, i32) {
    %c0_i32 = arith.constant 0 : i32
    %c0_i32_0 = arith.constant 0 : i32
    %c0_i32_1 = arith.constant 0 : i32
    %c0_i32_2 = arith.constant 0 : i32
    return %c0_i32, %c0_i32_0, %c0_i32_1 : i32, i32, i32
  }
  func.func @transform_9(%arg0: i32) -> (i32, i32, i32) {
    %c0_i32 = arith.constant 0 : i32
    %c0_i32_0 = arith.constant 0 : i32
    %c0_i32_1 = arith.constant 0 : i32
    %c0_i32_2 = arith.constant 0 : i32
    return %c0_i32, %c0_i32_0, %c0_i32_1 : i32, i32, i32
  }
  func.func @transform_10(%arg0: i32) -> (i32, i32, i32) {
    %c0_i32 = arith.constant 0 : i32
    %c0_i32_0 = arith.constant 0 : i32
    %c0_i32_1 = arith.constant 0 : i32
    %c0_i32_2 = arith.constant 0 : i32
    return %c0_i32, %c0_i32_0, %c0_i32_1 : i32, i32, i32
  }
  func.func @transform_11(%arg0: i32) -> (i32, i32, i32) {
    %c0_i32 = arith.constant 0 : i32
    %c0_i32_0 = arith.constant 0 : i32
    %c0_i32_1 = arith.constant 0 : i32
    %c0_i32_2 = arith.constant 0 : i32
    return %c0_i32, %c0_i32_0, %c0_i32_1 : i32, i32, i32
  }
  func.func @transform_12(%arg0: i32) -> (i32, i32, i32) {
    %c0_i32 = arith.constant 0 : i32
    %c0_i32_0 = arith.constant 0 : i32
    %c0_i32_1 = arith.constant 0 : i32
    %c0_i32_2 = arith.constant 0 : i32
    return %c0_i32, %c0_i32_0, %c0_i32_1 : i32, i32, i32
  }
  func.func @transform_13(%arg0: i32) -> (i32, i32, i32) {
    %c0_i32 = arith.constant 0 : i32
    %c0_i32_0 = arith.constant 0 : i32
    %c0_i32_1 = arith.constant 0 : i32
    %c0_i32_2 = arith.constant 0 : i32
    return %c0_i32, %c0_i32_0, %c0_i32_1 : i32, i32, i32
  }
  func.func @transform_14(%arg0: i32) -> (i32, i32, i32) {
    %c0_i32 = arith.constant 0 : i32
    %c0_i32_0 = arith.constant 0 : i32
    %c0_i32_1 = arith.constant 0 : i32
    %c0_i32_2 = arith.constant 0 : i32
    return %c0_i32, %c0_i32_0, %c0_i32_1 : i32, i32, i32
  }
  func.func @transform_15(%arg0: i32) -> (i32, i32, i32) {
    %c0_i32 = arith.constant 0 : i32
    %c0_i32_0 = arith.constant 0 : i32
    %c0_i32_1 = arith.constant 0 : i32
    %c0_i32_2 = arith.constant 0 : i32
    return %c0_i32, %c0_i32_0, %c0_i32_1 : i32, i32, i32
  }
  func.func @transform_16(%arg0: i32) -> (i32, i32, i32) {
    %c0_i32 = arith.constant 0 : i32
    %c0_i32_0 = arith.constant 0 : i32
    %c0_i32_1 = arith.constant 0 : i32
    %c0_i32_2 = arith.constant 0 : i32
    return %c0_i32, %c0_i32_0, %c0_i32_1 : i32, i32, i32
  }
  func.func @transform_17(%arg0: i32) -> (i32, i32, i32) {
    %c0_i32 = arith.constant 0 : i32
    %c0_i32_0 = arith.constant 0 : i32
    %c0_i32_1 = arith.constant 0 : i32
    %c0_i32_2 = arith.constant 0 : i32
    return %c0_i32, %c0_i32_0, %c0_i32_1 : i32, i32, i32
  }
  func.func @transform_18(%arg0: i32) -> (i32, i32) {
    %c0_i32 = arith.constant 0 : i32
    %c0_i32_0 = arith.constant 0 : i32
    %c0_i32_1 = arith.constant 0 : i32
    return %c0_i32, %c0_i32_0 : i32, i32
  }
  func.func @transform_19(%arg0: i32) -> (i32, i32) {
    %c0_i32 = arith.constant 0 : i32
    %c0_i32_0 = arith.constant 0 : i32
    %c0_i32_1 = arith.constant 0 : i32
    return %c0_i32, %c0_i32_0 : i32, i32
  }
  func.func @transform_20(%arg0: i32) -> (i32, i32) {
    %c0_i32 = arith.constant 0 : i32
    %c0_i32_0 = arith.constant 0 : i32
    %c0_i32_1 = arith.constant 0 : i32
    return %c0_i32, %c0_i32_0 : i32, i32
  }
  func.func @transform_21(%arg0: i32) -> (i32, i32) {
    %c0_i32 = arith.constant 0 : i32
    %c0_i32_0 = arith.constant 0 : i32
    %c0_i32_1 = arith.constant 0 : i32
    return %c0_i32, %c0_i32_0 : i32, i32
  }
  func.func @transform_22(%arg0: i32) -> (i32, i32) {
    %c0_i32 = arith.constant 0 : i32
    %c0_i32_0 = arith.constant 0 : i32
    %c0_i32_1 = arith.constant 0 : i32
    return %c0_i32, %c0_i32_0 : i32, i32
  }
}

</mosaic_0001>

<bundles_post_ra>
// kernel: my_model_forward.1
= control target key start
LH: loop header
LB: loop body
LE: loop exit
PB: predicated region body
PF: predicated region fallthrough
CT: control target
= control target key end

     0   :  { %s3144_s0 = inlined_call_operand.vmem [shape: s32[16,1], index: 0, kind: input, shape index: {}]   ;;  %s3145_s1 = inlined_call_operand.vmem [shape: s32[2,8], index: 1, kind: input, shape index: {}]   ;;  %s3146_s2 = inlined_call_operand.vmem [shape: f32[128,32], index: 2, kind: input, shape index: {}]   ;;  %s3147_s3 = inlined_call_operand.vmem [shape: f32[16,32], index: 3, kind: input, shape index: {}]   ;;  %s3148_s4 = inlined_call_operand.vmem [shape: f32[1,32], index: 4, kind: input, shape index: {}]   ;;  %s3149_s5 = inlined_call_operand.vmem [shape: f32[1,32], index: 5, kind: input, shape index: {}]   ;;  %s3150_s6 = inlined_call_operand.vmem [shape: bf16[2,32,96], index: 6, kind: input, shape index: {}]   ;;  %s3151_s7 = inlined_call_operand.vmem [shape: f32[2,1,96], index: 7, kind: input, shape index: {}]   ;;  %s3152_s8 = inlined_call_operand.vmem [shape: bf16[8,8,32], index: 8, kind: input, shape index: {}]   ;;  %s3153_s9 = inlined_call_operand.vmem [shape: f32[2,1,32], index: 9, kind: input, shape index: {}]   ;;  %s3154_s10 = inlined_call_operand.vmem [shape: f32[2,1,32], index: 10, kind: input, shape index: {}]   ;;  %s3155_s11 = inlined_call_operand.vmem [shape: f32[2,1,32], index: 11, kind: input, shape index: {}]   ;;  %s3156_s12 = inlined_call_operand.vmem [shape: bf16[2,32,64], index: 12, kind: input, shape index: {}]   ;;  %s3157_s13 = inlined_call_operand.vmem [shape: f32[2,1,64], index: 13, kind: input, shape index: {}]   ;;  %s3158_s14 = inlined_call_operand.vmem [shape: bf16[2,64,32], index: 14, kind: input, shape index: {}]   ;;  %s3159_s15 = inlined_call_operand.vmem [shape: f32[2,1,32], index: 15, kind: input, shape index: {}]   ;;  %s3160_s16 = inlined_call_operand.vmem [shape: f32[2,1,32], index: 16, kind: input, shape index: {}]   ;;  %s3161_s17 = inlined_call_operand.vmem [shape: f32[2,1,32], index: 17, kind: input, shape index: {}]   ;;  %s3162_s18 = inlined_call_operand.vmem [shape: bf16[32,32], index: 18, kind: input, shape index: {}]   ;;  %s3163_s19 = inlined_call_operand.vmem [shape: f32[1,32], index: 19, kind: input, shape index: {}]   ;;  %s3164_s20 = inlined_call_operand.vmem [shape: bf16[32,128], index: 20, kind: input, shape index: {}]   ;;  %s3165_s21 = inlined_call_operand.vmem [shape: f32[1,128], index: 21, kind: input, shape index: {}]   ;;  %s3166_s22 = inlined_call_operand.hbm [shape: f32[2,128], index: 22, kind: output, shape index: {}]  }
   0x1   :  { %3181 = sst [smem:[#allocation5_spill]] %s3144_s0 }
   0x2   :  { %3182 = sst [smem:[#allocation6_spill]] %s3145_s1 }
   0x3   :  { %3183 = sst [smem:[#allocation7_spill]] %s3146_s2 }
   0x4   :  { %3184 = sst [smem:[#allocation8_spill]] %s3147_s3 }
   0x5   :  { %3185 = sst [smem:[#allocation9_spill]] %s3148_s4 }
   0x6   :  { %3186 = sst [smem:[#allocation10_spill]] %s3149_s5 }
   0x7   :  { %3187 = sst [smem:[#allocation11_spill]] %s3150_s6 }
   0x8   :  { %3188 = sst [smem:[#allocation12_spill]] %s3161_s17 }
   0x9   :  { %s3189_s29 = sld [smem:[#allocation5_spill]]  ;;  %v2504_v2 = vmov 0  }
   0xa   :  { %s3190_s17 = sld [smem:[#allocation7_spill]]  ;;  %2331 = vset.pattern.permute.xlu0 %v2504_v2 }
   0xf   :  { %v73_v0 = vld [vmem:[%s3189_s29] sm:$0xff]  ;;  %v74_v6 = vld [vmem:[%s3189_s29 + $0x8] sm:$0xff] }
  0x10   :  { %v104_v1 = vld [vmem:[%s3190_s17 + $0x78] sm:$0xff]  ;;  %v103_v3 = vld [vmem:[%s3190_s17 + $0x70] sm:$0xff]  ;;  %78 = vperm.xlu0 %2331, %v73_v0   ;;  %v102_v4 = vld [vmem:[%s3190_s17 + $0x68] sm:$0xff] }
  0x11   :  { %106 = vmatpush.msra.mxu0 %v104_v1  ;;  %v101_v5 = vld [vmem:[%s3190_s17 + $0x60] sm:$0xff]  ;;  %v100_v7 = vld [vmem:[%s3190_s17 + $0x58] sm:$0xff]  ;;  %v99_v8 = vld [vmem:[%s3190_s17 + $0x50] sm:$0xff] }
  0x12   :  { %v98_v9 = vld [vmem:[%s3190_s17 + $0x48] sm:$0xff]  ;;  %v97_v10 = vld [vmem:[%s3190_s17 + $0x40] sm:$0xff] }
  0x13   :  { %107 = vmatpush.msra.mxu0 %v103_v3 }
  0x15   :  { %108 = vmatpush.msra.mxu0 %v102_v4 }
  0x17   :  { %109 = vmatpush.msra.mxu0 %v101_v5 }
  0x18   :  { %81 = vperm.xlu0 %2331, %v74_v6  }
  0x19   :  { %110 = vmatpush.msra.mxu0 %v100_v7 }
  0x1b   :  { %111 = vmatpush.msra.mxu0 %v99_v8 }
  0x1c   :  { %27 = vsyncpa [#allocation3], 0  ;;  %v96_v11 = vld [vmem:[%s3190_s17 + $0x38] sm:$0xff]  ;;  %v95_v12 = vld [vmem:[%s3190_s17 + $0x30] sm:$0xff]  ;;  %v75_v19 = vlaneseq  ;;  %v2505_v22 = vmov 1.0   ;;  %s3191_s24 = sld [smem:[#allocation8_spill]] }
  0x1d   :  { %112 = vmatpush.msra.mxu0 %v98_v9  ;;  %v94_v13 = vld [vmem:[%s3190_s17 + $0x28] sm:$0xff]  ;;  %v93_v14 = vld [vmem:[%s3190_s17 + $0x20] sm:$0xff]  ;;  %v92_v15 = vld [vmem:[%s3190_s17 + $0x18] sm:$0xff]  ;;  %vm131_vm2 = vcmask 261120   ;;  %v2506_v31 = vmov 32.0   ;;  %s3192_s25 = sld [smem:[#allocation11_spill]] }
  0x1e   :  { %v91_v16 = vld [vmem:[%s3190_s17 + $0x10] sm:$0xff]  ;;  %v90_v17 = vld [vmem:[%s3190_s17 + $0x8] sm:$0xff]  ;;  %v89_v18 = vld [vmem:[%s3190_s17] sm:$0xff]  ;;  %v76_v20 = vand.u32 127, %v75_v19  ;;  %2382 = vrcp.f32 %v2506_v31  ;;  %s3193_s28 = sld [smem:[#allocation9_spill]]  ;;  %s2507_s1 = smov 88  }
  0x1f   :  { %113 = vmatpush.msra.mxu0 %v97_v10  ;;  %s3194_s0 = sld [smem:[#allocation10_spill]]  ;;  %s2508_s5 = smov 96   ;;  %vm239_vm10 = vcmask 64512   ;;  %vm679_vm12 = vcmask 1043456  }
  0x20   :  { %s2510_s17 = smov 120   ;;  %s2511_s6 = smov 112  }
  0x21   :  { %114 = vmatpush.msra.mxu0 %v96_v11  ;;  %s2512_s26 = smov 72   ;;  %s3177_s2 = smov 104  }
  0x22   :  { %v105_v24 = vld [vmem:[%s3191_s24] sm:$0xff]  ;;  %s3179_s24 = smov 80   ;;  %s3175_s30 = smov 56  }
  0x23   :  { %115 = vmatpush.msra.mxu0 %v95_v12  ;;  %v2296_v48 = vld [vmem:[%s3192_s25 + $0x8] sm:$0xff]  ;;  %v2295_v50 = vld [vmem:[%s3192_s25] sm:$0xff]  ;;  %s3172_s4 = smov 64   ;;  %s3173_s27 = smov 48  }
  0x24   :  { %v2383_v32 = vpop.eup %2382  ;;  %228 = vmatpush.bf16.msra.mxu1 %v2296_v48  ;;  %v2362_v5 = vld [vmem:[%s3193_s28] ss:$0 sm:$0xff]  ;;  %s3195_s28 = sld [smem:[#allocation6_spill]] }
  0x25   :  { %116 = vmatpush.msra.mxu0 %v94_v13  ;;  %v139_v33 = vmul.f32 32.0, %v2383_v32  ;;  %vm143_vm3 = vweird.f32 %v2383_v32  ;;  %v2363_v10 = vld [vmem:[%s3194_s0] ss:$0 sm:$0xff]  ;;  %s3171_s0 = smov 40   ;;  %s3196_s29 = sld [smem:[#allocation12_spill]] }
  0x27   :  { %117 = vmatpush.msra.mxu0 %v93_v14  ;;  %v140_v34 = vsub.f32 1.0, %v139_v33 }
  0x28   :  { %229 = vmatpush.bf16.msra.mxu1 %v2295_v50 }
  0x29   :  { %118 = vmatpush.msra.mxu0 %v92_v15  ;;  %v141_v35 = vmul.f32 %v2383_v32, %v140_v34  ;;  %v2364_v15 = vld [vmem:[%s3151_s7] ss:$0 sm:$0xff] }
  0x2a   :  { %v193_v34 = vld [vmem:[%s3195_s28] sm:$0x3] }
  0x2b   :  { %119 = vmatpush.msra.mxu0 %v91_v16  ;;  %v142_v36 = vadd.f32 %v2383_v32, %v141_v35  ;;  %vm194_vm11 = vcmp.gt.s32.totalorder %v193_v34, 0  ;;  %v2514_v35 = vmov -1e+09  }
  0x2d   :  { %120 = vmatpush.msra.mxu0 %v90_v17  ;;  %v2694_v37 = vsel %vm143_vm3, %v2383_v32, %v142_v36  ;;  %v195_v36 = vsel %vm194_vm11, 0.0, %v2514_v35 }
  0x2f   :  { %121 = vmatpush.msra.mxu0 %v89_v18 }
  0x82   :  { %v79_v21 = vpop.permute.xlu0 %78 }
  0x83   :  { %vm83_vm0 = vcmp.eq.s32.totalorder %v79_v21, %v76_v20 }
  0x84   :  { %2118 = vmatmul.msk.f32.vlgmr.msra.gmra.mxu0 %vm83_vm0, %v2505_v22 }
  0x8a   :  { %v82_v23 = vpop.permute.xlu0 %81 }
  0x8b   :  { %vm84_vm1 = vcmp.eq.s32.totalorder %v82_v23, %v76_v20 }
  0x8c   :  { %2119 = vmatmul.msk.f32.gmra.mxu0 %vm84_vm1, %v2505_v22 }
 0x101   :  { %v123_v25 = vpop.f32.mrf.mxu0 }
 0x102   :  { %v124_v26 = vadd.f32 %v123_v25, %v105_v24 }
 0x104   :  { %v132_v27 = vsel %vm131_vm2, %v124_v26, 0.0 }
 0x105   :  { %133 = vadd.xlane.f32.xlu1 %v132_v27 }
 0x109   :  { %v126_v28 = vpop.f32.mrf.mxu0 }
 0x10a   :  { %v127_v29 = vadd.f32 %v126_v28, %v105_v24 }
 0x10c   :  { %v135_v30 = vsel %vm131_vm2, %v127_v29, 0.0 }
 0x10d   :  { %136 = vadd.xlane.f32.xlu1 %v135_v30 }
 0x178   :  { %v134_v38 = vpop.xlane.xlu1 %133 }
 0x179   :  { %v145_v39 = vmul.f32 %v2694_v37, %v134_v38  ;;  %v2777_v38 = vperm.slane %v195_v36, 0 }
 0x17b   :  { %v147_v40 = vsub.f32 %v124_v26, %v145_v39 }
 0x17d   :  { %v149_v41 = vmul.f32 %v147_v40, %v147_v40 }
 0x17f   :  { %v151_v42 = vsel %vm131_vm2, %v149_v41, 0.0 }
 0x180   :  { %152 = vadd.xlane.f32.xlu2 %v151_v42  ;;  %v137_v43 = vpop.xlane.xlu1 %136  ;;  %v197_v42 = vrot.slane %v195_v36, 1 }
 0x181   :  { %v146_v44 = vmul.f32 %v2694_v37, %v137_v43 }
 0x183   :  { %v148_v45 = vsub.f32 %v127_v29, %v146_v44  ;;  %v2781_v44 = vperm.slane %v197_v42, 0 }
 0x185   :  { %v150_v46 = vmul.f32 %v148_v45, %v148_v45 }
 0x187   :  { %v154_v47 = vsel %vm131_vm2, %v150_v46, 0.0 }
 0x188   :  { %155 = vadd.xlane.f32.xlu2 %v154_v47 }
 0x1f3   :  { %v153_v49 = vpop.xlane.xlu2 %152 }
 0x1f4   :  { %v157_v51 = vmul.f32 %v153_v49, %v2694_v37 }
 0x1f6   :  { %v159_v52 = vadd.f32 1e-12, %v157_v51 }
 0x1f8   :  { %2384 = vrsqrt.f32 %v159_v52  ;;  %vm167_vm5 = vweird.f32 %v159_v52 }
 0x1fb   :  { %v156_v53 = vpop.xlane.xlu2 %155 }
 0x1fc   :  { %v158_v54 = vmul.f32 %v156_v53, %v2694_v37 }
 0x1fe   :  { %v2385_v55 = vpop.eup %2384  ;;  %v160_v56 = vadd.f32 1e-12, %v158_v54 }
 0x1ff   :  { %v162_v57 = vmul.f32 %v2385_v55, %v159_v52  ;;  %vm168_vm4 = vweird.f32 %v2385_v55 }
 0x200   :  { %2386 = vrsqrt.f32 %v160_v56  ;;  %vm169_vm6 = vmor %vm167_vm5, %vm168_vm4  ;;  %vm177_vm8 = vweird.f32 %v160_v56  ;;  %vm1028_vm4 = vcmask 523264  }
 0x201   :  { %v163_v58 = vmul.f32 %v2385_v55, %v162_v57 }
 0x203   :  { %v164_v59 = vmul.f32 0.5, %v163_v58 }
 0x205   :  { %v165_v60 = vsub.f32 1.5, %v164_v59 }
 0x206   :  { %v2387_v61 = vpop.eup %2386 }
 0x207   :  { %v166_v62 = vmul.f32 %v2385_v55, %v165_v60  ;;  %v172_v63 = vmul.f32 %v2387_v61, %v160_v56  ;;  %vm178_vm7 = vweird.f32 %v2387_v61 }
 0x208   :  { %vm179_vm9 = vmor %vm177_vm8, %vm178_vm7 }
 0x209   :  { %v173_v0 = vmul.f32 %v2387_v61, %v172_v63  ;;  %v170_v1 = vsel %vm169_vm6, %v2385_v55, %v166_v62 }
 0x20a   :  { %v181_v4 = vmul.f32 %v170_v1, %v147_v40 }
 0x20b   :  { %v174_v2 = vmul.f32 0.5, %v173_v0 }
 0x20c   :  { %v186_v9 = vmul.f32 %v2362_v5, %v181_v4 }
 0x20d   :  { %v175_v3 = vsub.f32 1.5, %v174_v2 }
 0x20e   :  { %v2714_v12 = vadd.f32 %v2363_v10, %v186_v9 }
 0x20f   :  { %v176_v6 = vmul.f32 %v2387_v61, %v175_v3 }
 0x211   :  { %v180_v7 = vsel %vm179_vm9, %v2387_v61, %v176_v6 }
 0x212   :  { %v182_v8 = vmul.f32 %v180_v7, %v148_v45 }
 0x214   :  { %v187_v11 = vmul.f32 %v2362_v5, %v182_v8 }
 0x216   :  { %v2716_v13 = vadd.f32 %v2363_v10, %v187_v11 }
 0x218   :  { %v198_v14 = vpack.c.bf16 %v2716_v13, %v2714_v12 }
 0x21a   :  { %2128 = vmatmul.msk.bf16.vlgmr.msra.gmra.mxu1 %vm131_vm2, %v198_v14 }
 0x297   :  { %v231_v16 = vpop.f32.mrf.mxu1 }
 0x298   :  { %v2724_v17 = vadd.f32 %v2364_v15, %v231_v16 }
 0x29a   :  { %293 = vrot.lane.b32.xlu2 %v2724_v17, %s2507_s1  ;;  %237 = vrot.lane.b32.xlu0 %v2724_v17, %s2508_s5 }
 0x29f   :  { %v233_v18 = vpop.f32.mrf.mxu1 }
 0x2a0   :  { %v2730_v19 = vadd.f32 %v2364_v15, %v233_v18 }
 0x2a2   :  { %265 = vrot.lane.b32.xlu1 %v2730_v19, %s2508_s5  ;;  %349 = vrot.lane.b32.xlu2 %v2724_v17, %s3179_s24 }
 0x2a3   :  { %291 = vrot.lane.b32.xlu0 %v2724_v17, %s2510_s17 }
 0x2aa   :  { %377 = vrot.lane.b32.xlu1 %v2730_v19, %s3179_s24  ;;  %375 = vrot.lane.b32.xlu2 %v2730_v19, %s2511_s6 }
 0x2ab   :  { %321 = vrot.lane.b32.xlu0 %v2730_v19, %s2507_s1 }
 0x2b2   :  { %433 = vrot.lane.b32.xlu1 %v2730_v19, %s2512_s26  ;;  %405 = vrot.lane.b32.xlu2 %v2724_v17, %s2512_s26 }
 0x2b3   :  { %319 = vrot.lane.b32.xlu0 %v2730_v19, %s2510_s17 }
 0x2ba   :  { %403 = vrot.lane.b32.xlu1 %v2724_v17, %s3177_s2 }
 0x2bb   :  { %347 = vrot.lane.b32.xlu0 %v2724_v17, %s2511_s6 }
 0x2c3   :  { %431 = vrot.lane.b32.xlu0 %v2730_v19, %s3177_s2 }
 0x2f4   :  { %v294_v20 = vpop.permute.xlu2 %293 }
 0x2fc   :  { %v350_v21 = vpop.permute.xlu2 %349 }
 0x304   :  { %v376_v22 = vpop.permute.xlu2 %375 }
 0x30c   :  { %v406_v23 = vpop.permute.xlu2 %405  ;;  %v238_v24 = vpop.permute.xlu0 %237 }
 0x30d   :  { %2129 = vmatpush.xpose.msk.msra.mxu2 %vm239_vm10, %v238_v24  ;;  %2141 = vmatpush.xpose.msk.msrb.mxu1 %vm239_vm10, %v406_v23  ;;  %v2806_v23 = vpack.i.bf16 %v2730_v19, %v2724_v17 }
 0x310   :  { %2130 = vmatmul.msk.f32.vlgmr.msra.gmra.mxu2 %vm239_vm10, %v2724_v17 }
 0x311   :  { %2133 = vmatpush.xpose.msk.msrb.mxu2 %vm239_vm10, %v294_v20 }
 0x314   :  { %v266_v25 = vpop.permute.xlu1 %265 }
 0x315   :  { %2137 = vmatpush.xpose.msk.msra.mxu2 %vm239_vm10, %v350_v21  ;;  %v292_v26 = vpop.permute.xlu0 %291  ;;  %2131 = vmatpush.xpose.msk.msra.mxu3 %vm239_vm10, %v266_v25 }
 0x318   :  { %2132 = vmatmul.msk.f32.vlgmr.msra.gmra.mxu3 %vm239_vm10, %v2730_v19  ;;  %2134 = vmatmul.msk.f32.vlgmr.msrb.gmra.mxu2 %vm239_vm10, %v292_v26 }
 0x31c   :  { %v378_v27 = vpop.permute.xlu1 %377 }
 0x31d   :  { %v322_v28 = vpop.permute.xlu0 %321 }
 0x31e   :  { %2135 = vmatpush.xpose.msk.msrb.mxu3 %vm239_vm10, %v322_v28 }
 0x322   :  { %2139 = vmatpush.xpose.msk.msra.mxu3 %vm239_vm10, %v378_v27 }
 0x324   :  { %v434_v29 = vpop.permute.xlu1 %433 }
 0x325   :  { %v320_v30 = vpop.permute.xlu0 %319  ;;  %2143 = vmatpush.xpose.msk.msrb.mxu2 %vm239_vm10, %v434_v29 }
 0x326   :  { %2136 = vmatmul.msk.f32.vlgmr.msrb.gmra.mxu3 %vm239_vm10, %v320_v30 }
 0x32c   :  { %v404_v31 = vpop.permute.xlu1 %403 }
 0x32d   :  { %v348_v32 = vpop.permute.xlu0 %347  ;;  %2142 = vmatmul.msk.f32.vlgmr.msrb.gmra.mxu1 %vm239_vm10, %v404_v31 }
 0x32e   :  { %2138 = vmatmul.msk.f32.vlgmr.msra.gmra.mxu2 %vm239_vm10, %v348_v32  ;;  %2140 = vmatmul.msk.f32.vlgmr.msra.gmra.mxu3 %vm239_vm10, %v376_v22 }
 0x335   :  { %v432_v33 = vpop.permute.xlu0 %431 }
 0x336   :  { %2144 = vmatmul.msk.f32.vlgmr.msrb.gmra.mxu2 %vm239_vm10, %v432_v33 }
 0x393   :  { %v261_v39 = vpop.f32.mrf.mxu2 }
 0x394   :  { %v459_v40 = vmul.f32 0.35355338, %v261_v39 }
 0x396   :  { %v471_v41 = vadd.f32 %v2777_v38, %v459_v40 }
 0x398   :  { %v479_v43 = vsel %vm239_vm10, %v471_v41, -inf }
 0x399   :  { %480 = vmax.xlane.f32.xlu0 %v479_v43 }
 0x39b   :  { %v288_v45 = vpop.f32.mrf.mxu3  ;;  %v316_v46 = vpop.f32.mrf.mxu2 }
 0x39c   :  { %v463_v47 = vmul.f32 0.35355338, %v288_v45  ;;  %v460_v48 = vmul.f32 0.35355338, %v316_v46 }
 0x39e   :  { %v475_v49 = vadd.f32 %v2781_v44, %v463_v47  ;;  %v472_v50 = vadd.f32 %v2777_v38, %v460_v48 }
 0x3a0   :  { %v491_v51 = vsel %vm239_vm10, %v475_v49, -inf  ;;  %v482_v52 = vsel %vm239_vm10, %v472_v50, -inf }
 0x3a1   :  { %492 = vmax.xlane.f32.xlu2 %v491_v51  ;;  %483 = vmax.xlane.f32.xlu1 %v482_v52 }
 0x3a9   :  { %v344_v53 = vpop.f32.mrf.mxu3 }
 0x3aa   :  { %v464_v54 = vmul.f32 0.35355338, %v344_v53  ;;  %v428_v25 = vpop.f32.mrf.mxu1 }
 0x3ab   :  { %v462_v26 = vmul.f32 0.35355338, %v428_v25 }
 0x3ac   :  { %v476_v55 = vadd.f32 %v2781_v44, %v464_v54 }
 0x3ad   :  { %v474_v28 = vadd.f32 %v2777_v38, %v462_v26 }
 0x3ae   :  { %v494_v56 = vsel %vm239_vm10, %v476_v55, -inf }
 0x3af   :  { %495 = vmax.xlane.f32.xlu2 %v494_v56  ;;  %v488_v17 = vsel %vm239_vm10, %v474_v28, -inf }
 0x3b1   :  { %v372_v11 = vpop.f32.mrf.mxu2  ;;  %v400_v20 = vpop.f32.mrf.mxu3 }
 0x3b2   :  { %v461_v15 = vmul.f32 0.35355338, %v372_v11  ;;  %v465_v21 = vmul.f32 0.35355338, %v400_v20 }
 0x3b4   :  { %v473_v18 = vadd.f32 %v2777_v38, %v461_v15  ;;  %v477_v24 = vadd.f32 %v2781_v44, %v465_v21 }
 0x3b6   :  { %v485_v22 = vsel %vm239_vm10, %v473_v18, -inf  ;;  %v497_v27 = vsel %vm239_vm10, %v477_v24, -inf }
 0x3b9   :  { %v456_v19 = vpop.f32.mrf.mxu2 }
 0x3ba   :  { %v466_v29 = vmul.f32 0.35355338, %v456_v19 }
 0x3bc   :  { %v478_v30 = vadd.f32 %v2781_v44, %v466_v29 }
 0x3be   :  { %v500_v31 = vsel %vm239_vm10, %v478_v30, -inf }
 0x40c   :  { %v481_v57 = vpop.xlane.xlu0 %480 }
 0x40d   :  { %v503_v58 = vsub.f32 %v471_v41, %v481_v57 }
 0x40f   :  { %v511_v59 = vmul.f32 1.442695, %v503_v58 }
 0x411   :  { %2388 = vpow2.f32 %v511_v59 }
 0x414   :  { %v493_v60 = vpop.xlane.xlu2 %492  ;;  %v484_v61 = vpop.xlane.xlu1 %483 }
 0x415   :  { %v507_v62 = vsub.f32 %v475_v49, %v493_v60  ;;  %v504_v63 = vsub.f32 %v472_v50, %v484_v61 }
 0x417   :  { %v2789_v0 = vpop.eup %2388  ;;  %v519_v1 = vmul.f32 1.442695, %v507_v62  ;;  %v513_v2 = vmul.f32 1.442695, %v504_v63 }
 0x418   :  { %v527_v3 = vsel %vm239_vm10, %v2789_v0, 0.0 }
 0x419   :  { %2390 = vpow2.f32 %v519_v1  ;;  %528 = vadd.xlane.f32.xlu0 %v527_v3 }
 0x41a   :  { %2392 = vpow2.f32 %v513_v2 }
 0x41f   :  { %v2793_v4 = vpop.eup %2390 }
 0x420   :  { %v2393_v5 = vpop.eup %2392  ;;  %v539_v6 = vsel %vm239_vm10, %v2793_v4, 0.0 }
 0x421   :  { %540 = vadd.xlane.f32.xlu1 %v539_v6  ;;  %v530_v7 = vsel %vm239_vm10, %v2393_v5, 0.0 }
 0x422   :  { %531 = vadd.xlane.f32.xlu2 %v530_v7  ;;  %v496_v8 = vpop.xlane.xlu2 %495 }
 0x423   :  { %v508_v9 = vsub.f32 %v476_v55, %v496_v8 }
 0x425   :  { %v521_v10 = vmul.f32 1.442695, %v508_v9 }
 0x427   :  { %2394 = vpow2.f32 %v521_v10 }
 0x42d   :  { %v2798_v14 = vpop.eup %2394 }
 0x42e   :  { %v542_v16 = vsel %vm239_vm10, %v2798_v14, 0.0 }
 0x42f   :  { %543 = vadd.xlane.f32.xlu0 %v542_v16  ;;  %v620_v16 = vld [vmem:[%s3152_s8] sm:$0xf] }
 0x437   :  { %486 = vmax.xlane.f32.xlu0 %v485_v22 }
 0x43a   :  { %2338 = vrot.lane.b32.xlu2 %v2806_v23, %s3175_s30  ;;  %2333 = vrot.lane.b32.xlu1 %v2806_v23, %s3172_s4  ;;  %s3198_s30 = smov 104  }
 0x43f   :  { %498 = vmax.xlane.f32.xlu0 %v497_v27 }
 0x447   :  { %489 = vmax.xlane.f32.xlu0 %v488_v17 }
 0x464   :  { %501 = vmax.xlane.f32.xlu1 %v500_v31 }
 0x47d   :  { %2348 = vrot.lane.b32.xlu1 %v2806_v23, %s3171_s0  ;;  %s2107_s0 = sshll.u32 %s3166_s22, 4  ;;  %s2108_s0 = int_to_ptr.hbm [resolvable:$true] %s2107_s0 }
 0x48c   :  { %v529_v33 = vpop.xlane.xlu0 %528 }
 0x494   :  { %v541_v40 = vpop.xlane.xlu1 %540 }
 0x495   :  { %v532_v32 = vpop.xlane.xlu2 %531 }
 0x496   :  { %2396 = vrcp.f32 %v532_v32 }
 0x497   :  { %2398 = vrcp.f32 %v529_v33 }
 0x498   :  { %2400 = vrcp.f32 %v541_v40 }
 0x49c   :  { %v2397_v34 = vpop.eup %2396 }
 0x49d   :  { %v2339_v35 = vpop.permute.xlu2 %2338  ;;  %v560_v39 = vmul.f32 %v2397_v34, %v2393_v5  ;;  %v2399_v42 = vpop.eup %2398 }
 0x49e   :  { %v2340_v36 = vunpack.i.l.bf16 %v2339_v35  ;;  %v2401_v45 = vpop.eup %2400  ;;  %v559_v51 = vmul.f32 %v2399_v42, %v2789_v0  ;;  %v2341_v53 = vunpack.i.h.bf16 %v2339_v35 }
 0x49f   :  { %v563_v52 = vmul.f32 %v2401_v45, %v2793_v4  ;;  %v2149_v4 = vld [vmem:[%s3152_s8 + $0x4] sm:$0xf]  ;;  %v2158_v45 = vld [vmem:[%s3152_s8 + $0xc] sm:$0xf] }
 0x4a0   :  { %642 = vmatpush.msra.mxu2 %v2340_v36  ;;  %v681_v5 = vsel %vm679_vm12, %v2149_v4, 0 }
 0x4a1   :  { %2147 = vmatmul.msk.f32.vlgmr.msra.gmra.mxu2 %vm239_vm10, %v560_v39 }
 0x4a2   :  { %v544_v41 = vpop.xlane.xlu0 %543 }
 0x4a3   :  { %2402 = vrcp.f32 %v544_v41 }
 0x4a9   :  { %v2403_v55 = vpop.eup %2402 }
 0x4aa   :  { %v487_v43 = vpop.xlane.xlu0 %486  ;;  %v564_v57 = vmul.f32 %v2403_v55, %v2798_v14 }
 0x4ab   :  { %v505_v46 = vsub.f32 %v473_v18, %v487_v43  ;;  %v701_v18 = vsel %vm679_vm12, %v620_v16, 0 }
 0x4ac   :  { %v2334_v47 = vpop.permute.xlu1 %2333  ;;  %710 = vmatpush.bf16.msrb.mxu2 %v701_v18 }
 0x4ad   :  { %v515_v48 = vmul.f32 1.442695, %v505_v46  ;;  %v2336_v49 = vunpack.i.h.bf16 %v2334_v47  ;;  %v2335_v50 = vunpack.i.l.bf16 %v2334_v47  ;;  %v853_v46 = vsel %vm679_vm12, %v2158_v45, 0 }
 0x4af   :  { %2404 = vpow2.f32 %v515_v48  ;;  %588 = vmatpush.msrb.mxu3 %v2335_v50  ;;  %614 = vmatpush.msra.mxu1 %v2336_v49  ;;  %v2154_v50 = vld [vmem:[%s3152_s8 + $0x8] sm:$0xf] }
 0x4b0   :  { %2145 = vmatmul.msk.f32.vlgmr.msrb.gmra.mxu3 %vm239_vm10, %v559_v51  ;;  %2146 = vmatmul.msk.f32.vlgmr.msra.gmra.mxu1 %vm239_vm10, %v563_v52  ;;  %v776_v51 = vsel %vm679_vm12, %v2154_v50, 0 }
 0x4b1   :  { %668 = vmatpush.msra.mxu3 %v2341_v53  ;;  %690 = vmatpush.bf16.msrb.mxu1 %v681_v5 }
 0x4b2   :  { %v499_v54 = vpop.xlane.xlu0 %498 }
 0x4b3   :  { %v509_v61 = vsub.f32 %v477_v24, %v499_v54 }
 0x4b5   :  { %v2825_v56 = vpop.eup %2404  ;;  %v523_v63 = vmul.f32 1.442695, %v509_v61  ;;  %v2365_v61 = vld [vmem:[%s3153_s9] ss:$0 sm:$0xff] }
 0x4b6   :  { %v533_v58 = vsel %vm239_vm10, %v2825_v56, 0.0 }
 0x4b7   :  { %534 = vadd.xlane.f32.xlu2 %v533_v58 }
 0x4b8   :  { %2148 = vmatmul.msk.f32.vlgmr.msra.gmra.mxu3 %vm239_vm10, %v564_v57 }
 0x4ba   :  { %v490_v59 = vpop.xlane.xlu0 %489 }
 0x4bb   :  { %v506_v60 = vsub.f32 %v474_v28, %v490_v59 }
 0x4bd   :  { %v517_v62 = vmul.f32 1.442695, %v506_v60 }
 0x4bf   :  { %2406 = vpow2.f32 %v517_v62 }
 0x4c0   :  { %2408 = vpow2.f32 %v523_v63 }
 0x4c5   :  { %v2407_v0 = vpop.eup %2406 }
 0x4c6   :  { %v536_v1 = vsel %vm239_vm10, %v2407_v0, 0.0  ;;  %v2409_v2 = vpop.eup %2408 }
 0x4c7   :  { %537 = vadd.xlane.f32.xlu0 %v536_v1  ;;  %v545_v3 = vsel %vm239_vm10, %v2409_v2, 0.0 }
 0x4cf   :  { %546 = vadd.xlane.f32.xlu0 %v545_v3 }
 0x4d7   :  { %v502_v6 = vpop.xlane.xlu1 %501 }
 0x4d8   :  { %v510_v7 = vsub.f32 %v478_v30, %v502_v6 }
 0x4da   :  { %v525_v8 = vmul.f32 1.442695, %v510_v7 }
 0x4dc   :  { %2410 = vpow2.f32 %v525_v8 }
 0x4e2   :  { %v2411_v9 = vpop.eup %2410 }
 0x4e3   :  { %v548_v10 = vsel %vm239_vm10, %v2411_v9, 0.0 }
 0x4e4   :  { %549 = vadd.xlane.f32.xlu0 %v548_v10 }
 0x4ef   :  { %v2349_v11 = vpop.permute.xlu1 %2348 }
 0x4f0   :  { %v2351_v14 = vunpack.i.h.bf16 %v2349_v11  ;;  %v2350_v15 = vunpack.i.l.bf16 %v2349_v11 }
 0x4f2   :  { %815 = vmatpush.msrb.mxu0 %v2350_v15  ;;  %841 = vmatpush.msra.mxu1 %v2351_v14 }
 0x4f8   :  { %2343 = vrot.lane.b32.xlu0 %v2806_v23, %s3173_s27 }
 0x524   :  { %v644_v25 = vpop.f32.mrf.mxu2 }
 0x52a   :  { %v535_v30 = vpop.xlane.xlu2 %534 }
 0x52d   :  { %v616_v20 = vpop.f32.mrf.mxu1 }
 0x533   :  { %v590_v21 = vpop.f32.mrf.mxu3 }
 0x534   :  { %v619_v22 = vpack.c.bf16 %v616_v20, %v590_v21 }
 0x536   :  { %2151 = vmatmul.msk.bf16.vlgmr.msrb.gmra.mxu2 %vm239_vm10, %v619_v22 }
 0x53a   :  { %v538_v24 = vpop.xlane.xlu0 %537 }
 0x53b   :  { %2412 = vrcp.f32 %v538_v24  ;;  %v670_v26 = vpop.f32.mrf.mxu3 }
 0x53c   :  { %v673_v27 = vpack.c.bf16 %v670_v26, %v644_v25  ;;  %v2297_v26 = vld [vmem:[%s3156_s12] sm:$0xff] }
 0x53e   :  { %2150 = vmatmul.msk.bf16.vlgmr.msrb.gmra.mxu1 %vm239_vm10, %v673_v27 }
 0x541   :  { %v2413_v23 = vpop.eup %2412 }
 0x542   :  { %v562_v28 = vmul.f32 %v2413_v23, %v2407_v0  ;;  %v547_v17 = vpop.xlane.xlu0 %546 }
 0x544   :  { %2156 = vmatmul.msk.f32.vlgmr.msrb.gmra.mxu0 %vm239_vm10, %v562_v28 }
 0x557   :  { %v550_v19 = vpop.xlane.xlu0 %549 }
 0x558   :  { %2414 = vrcp.f32 %v550_v19 }
 0x559   :  { %2416 = vrcp.f32 %v535_v30 }
 0x55a   :  { %2418 = vrcp.f32 %v547_v17 }
 0x55e   :  { %v2415_v29 = vpop.eup %2414 }
 0x55f   :  { %v566_v31 = vmul.f32 %v2415_v29, %v2411_v9  ;;  %v2417_v32 = vpop.eup %2416 }
 0x560   :  { %v2419_v33 = vpop.eup %2418  ;;  %v561_v39 = vmul.f32 %v2417_v32, %v2825_v56 }
 0x561   :  { %2157 = vmatmul.msk.f32.vlgmr.msra.gmra.mxu1 %vm239_vm10, %v566_v31  ;;  %v565_v40 = vmul.f32 %v2419_v33, %v2409_v2 }
 0x56a   :  { %v2344_v34 = vpop.permute.xlu0 %2343 }
 0x56b   :  { %v2346_v35 = vunpack.i.h.bf16 %v2344_v34  ;;  %v2345_v36 = vunpack.i.l.bf16 %v2344_v34 }
 0x56d   :  { %738 = vmatpush.msrb.mxu3 %v2345_v36  ;;  %764 = vmatpush.msra.mxu2 %v2346_v35 }
 0x56e   :  { %2152 = vmatmul.msk.f32.vlgmr.msrb.gmra.mxu3 %vm239_vm10, %v561_v39  ;;  %2153 = vmatmul.msk.f32.vlgmr.msra.gmra.mxu2 %vm239_vm10, %v565_v40 }
 0x56f   :  { %862 = vmatpush.bf16.msrb.mxu2 %v853_v46  ;;  %785 = vmatpush.bf16.msra.mxu3 %v776_v51  ;;  %v2367_v46 = vld [vmem:[%s3155_s11] ss:$0 sm:$0xff] }
 0x5b9   :  { %v712_v41 = vpop.f32.mrf.mxu2 }
 0x5bb   :  { %v692_v42 = vpop.f32.mrf.mxu1 }
 0x5bc   :  { %v713_v43 = vadd.f32 %v712_v41, %v692_v42  ;;  %v2366_v41 = vld [vmem:[%s3154_s10] ss:$0 sm:$0xff] }
 0x5c1   :  { %v714_v47 = vpop.f32.mrf.mxu2  ;;  %v817_v52 = vpop.f32.mrf.mxu0 }
 0x5c3   :  { %v694_v48 = vpop.f32.mrf.mxu1 }
 0x5c4   :  { %v715_v49 = vadd.f32 %v714_v47, %v694_v48 }
 0x5de   :  { %v843_v53 = vpop.f32.mrf.mxu1 }
 0x5df   :  { %v846_v54 = vpack.c.bf16 %v843_v53, %v817_v52  ;;  %v2302_v53 = vld [vmem:[%s3158_s14 + $0x18] sm:$0xff] }
 0x5e0   :  { %1036 = vmatpush.bf16.msrb.mxu3 %v2302_v53 }
 0x5e1   :  { %2159 = vmatmul.msk.bf16.vlgmr.msrb.gmra.mxu2 %vm239_vm10, %v846_v54  ;;  %v2301_v54 = vld [vmem:[%s3158_s14 + $0x10] sm:$0xff] }
 0x5e4   :  { %1037 = vmatpush.bf16.msrb.mxu3 %v2301_v54 }
 0x5f1   :  { %v740_v55 = vpop.f32.mrf.mxu3  ;;  %v766_v56 = vpop.f32.mrf.mxu2 }
 0x5f2   :  { %v769_v57 = vpack.c.bf16 %v766_v56, %v740_v55  ;;  %v2300_v55 = vld [vmem:[%s3158_s14 + $0x8] sm:$0xff]  ;;  %v2368_v56 = vld [vmem:[%s3157_s13] ss:$0 sm:$0xff] }
 0x5f3   :  { %1038 = vmatpush.bf16.msrb.mxu3 %v2300_v55 }
 0x5f4   :  { %2155 = vmatmul.msk.bf16.vlgmr.msra.gmra.mxu3 %vm239_vm10, %v769_v57 }
 0x664   :  { %v864_v58 = vpop.f32.mrf.mxu2 }
 0x66c   :  { %v866_v4 = vpop.f32.mrf.mxu2 }
 0x677   :  { %v787_v59 = vpop.f32.mrf.mxu3 }
 0x678   :  { %v792_v60 = vadd.f32 %v787_v59, %v713_v43 }
 0x67a   :  { %v869_v62 = vadd.f32 %v864_v58, %v792_v60  ;;  %v2299_v58 = vld [vmem:[%s3158_s14] sm:$0xff] }
 0x67b   :  { %1039 = vmatpush.bf16.msrb.mxu3 %v2299_v58 }
 0x67c   :  { %v875_v63 = vadd.f32 %v2365_v61, %v869_v62 }
 0x67e   :  { %v877_v0 = vadd.f32 %v875_v63, %v2714_v12 }
 0x67f   :  { %v789_v1 = vpop.f32.mrf.mxu3 }
 0x680   :  { %v793_v2 = vadd.f32 %v789_v1, %v715_v49  ;;  %v881_v3 = vsel %vm131_vm2, %v877_v0, 0.0 }
 0x681   :  { %882 = vadd.xlane.f32.xlu2 %v881_v3 }
 0x682   :  { %v870_v5 = vadd.f32 %v866_v4, %v793_v2 }
 0x684   :  { %v876_v6 = vadd.f32 %v2365_v61, %v870_v5 }
 0x686   :  { %v878_v7 = vadd.f32 %v876_v6, %v2716_v13  ;;  %v2298_v13 = vld [vmem:[%s3156_s12 + $0x8] sm:$0xff] }
 0x687   :  { %965 = vmatpush.bf16.msra.mxu0 %v2298_v13 }
 0x688   :  { %v884_v8 = vsel %vm131_vm2, %v878_v7, 0.0 }
 0x689   :  { %885 = vadd.xlane.f32.xlu0 %v884_v8 }
 0x68b   :  { %966 = vmatpush.bf16.msra.mxu0 %v2297_v26 }
 0x6f4   :  { %v883_v9 = vpop.xlane.xlu2 %882 }
 0x6f5   :  { %v887_v10 = vmul.f32 %v883_v9, %v2694_v37 }
 0x6f7   :  { %v889_v11 = vsub.f32 %v877_v0, %v887_v10 }
 0x6f9   :  { %v891_v14 = vmul.f32 %v889_v11, %v889_v11 }
 0x6fb   :  { %v893_v12 = vsel %vm131_vm2, %v891_v14, 0.0 }
 0x6fc   :  { %894 = vadd.xlane.f32.xlu2 %v893_v12  ;;  %v886_v15 = vpop.xlane.xlu0 %885 }
 0x6fd   :  { %v888_v16 = vmul.f32 %v886_v15, %v2694_v37 }
 0x6ff   :  { %v890_v18 = vsub.f32 %v878_v7, %v888_v16 }
 0x701   :  { %v892_v20 = vmul.f32 %v890_v18, %v890_v18 }
 0x703   :  { %v896_v21 = vsel %vm131_vm2, %v892_v20, 0.0  ;;  %v2369_v20 = vld [vmem:[%s3159_s15] ss:$0 sm:$0xff] }
 0x704   :  { %897 = vadd.xlane.f32.xlu2 %v896_v21 }
 0x76f   :  { %v895_v22 = vpop.xlane.xlu2 %894 }
 0x770   :  { %v899_v24 = vmul.f32 %v895_v22, %v2694_v37 }
 0x772   :  { %v901_v25 = vadd.f32 1e-12, %v899_v24 }
 0x774   :  { %2420 = vrsqrt.f32 %v901_v25  ;;  %vm909_vm14 = vweird.f32 %v901_v25 }
 0x777   :  { %v898_v27 = vpop.xlane.xlu2 %897 }
 0x778   :  { %v900_v23 = vmul.f32 %v898_v27, %v2694_v37 }
 0x77a   :  { %v2421_v28 = vpop.eup %2420  ;;  %v902_v17 = vadd.f32 1e-12, %v900_v23 }
 0x77b   :  { %v904_v19 = vmul.f32 %v2421_v28, %v901_v25  ;;  %vm910_vm13 = vweird.f32 %v2421_v28 }
 0x77c   :  { %2422 = vrsqrt.f32 %v902_v17  ;;  %vm911_vm15 = vmor %vm909_vm14, %vm910_vm13  ;;  %vm919_vm1 = vweird.f32 %v902_v17 }
 0x77d   :  { %v905_v29 = vmul.f32 %v2421_v28, %v904_v19 }
 0x77f   :  { %v906_v30 = vmul.f32 0.5, %v905_v29 }
 0x781   :  { %v907_v31 = vsub.f32 1.5, %v906_v30 }
 0x782   :  { %v2423_v32 = vpop.eup %2422 }
 0x783   :  { %v908_v33 = vmul.f32 %v2421_v28, %v907_v31  ;;  %v914_v34 = vmul.f32 %v2423_v32, %v902_v17  ;;  %vm920_vm0 = vweird.f32 %v2423_v32 }
 0x784   :  { %vm921_vm3 = vmor %vm919_vm1, %vm920_vm0 }
 0x785   :  { %v915_v35 = vmul.f32 %v2423_v32, %v914_v34  ;;  %v912_v36 = vsel %vm911_vm15, %v2421_v28, %v908_v33 }
 0x786   :  { %v923_v42 = vmul.f32 %v912_v36, %v889_v11  ;;  %v2304_v36 = vld [vmem:[%s3192_s25 + $0x18] sm:$0xff] }
 0x787   :  { %v916_v39 = vmul.f32 0.5, %v915_v35  ;;  %1136 = vmatpush.bf16.msrb.mxu1 %v2304_v36 }
 0x788   :  { %v928_v47 = vmul.f32 %v2366_v41, %v923_v42  ;;  %v2303_v42 = vld [vmem:[%s3192_s25 + $0x10] sm:$0xff] }
 0x789   :  { %v917_v40 = vsub.f32 1.5, %v916_v39 }
 0x78a   :  { %v933_v50 = vadd.f32 %v2367_v46, %v928_v47 }
 0x78b   :  { %v918_v43 = vmul.f32 %v2423_v32, %v917_v40  ;;  %1137 = vmatpush.bf16.msrb.mxu1 %v2303_v42 }
 0x78d   :  { %v922_v45 = vsel %vm921_vm3, %v2423_v32, %v918_v43 }
 0x78e   :  { %v924_v48 = vmul.f32 %v922_v45, %v890_v18 }
 0x790   :  { %v929_v49 = vmul.f32 %v2366_v41, %v924_v48 }
 0x792   :  { %v934_v51 = vadd.f32 %v2367_v46, %v929_v49 }
 0x794   :  { %v935_v52 = vpack.c.bf16 %v934_v51, %v933_v50 }
 0x796   :  { %2168 = vmatmul.msk.bf16.vlgmr.msra.gmra.mxu0 %vm131_vm2, %v935_v52 }
 0x813   :  { %v968_v57 = vpop.f32.mrf.mxu0 }
 0x814   :  { %v969_v59 = vadd.f32 %v2368_v56, %v968_v57 }
 0x816   :  { %v973_v60 = vmul.f32 %v969_v59, %v969_v59 }
 0x818   :  { %v975_v61 = vmul.f32 %v973_v60, %v969_v59 }
 0x81a   :  { %v977_v62 = vmul.f32 0.044715, %v975_v61 }
 0x81b   :  { %v970_v63 = vpop.f32.mrf.mxu0 }
 0x81c   :  { %v979_v0 = vadd.f32 %v977_v62, %v969_v59  ;;  %v971_v1 = vadd.f32 %v2368_v56, %v970_v63  ;;  %v2371_v63 = vld [vmem:[%s3196_s29] ss:$0 sm:$0xff] }
 0x81e   :  { %v981_v2 = vmul.f32 0.7978846, %v979_v0  ;;  %v974_v3 = vmul.f32 %v971_v1, %v971_v1 }
 0x820   :  { %v976_v4 = vmul.f32 %v974_v3, %v971_v1  ;;  %2424 = vtanh.f32 %v981_v2 }
 0x822   :  { %v978_v5 = vmul.f32 0.044715, %v976_v4 }
 0x824   :  { %v980_v6 = vadd.f32 %v978_v5, %v971_v1 }
 0x826   :  { %v982_v7 = vmul.f32 0.7978846, %v980_v6  ;;  %v2425_v8 = vpop.eup %2424  ;;  %v2372_v6 = vld [vmem:[%s3151_s7 + $0x1] ss:$0 sm:$0xff]  ;;  %s3197_s7 = smov 80  }
 0x827   :  { %v985_v9 = vadd.f32 1.0, %v2425_v8 }
 0x828   :  { %2426 = vtanh.f32 %v982_v7 }
 0x829   :  { %v987_v11 = vmul.f32 0.5, %v985_v9 }
 0x82b   :  { %v989_v15 = vmul.f32 %v987_v11, %v969_v59  ;;  %v2370_v59 = vld [vmem:[%s3160_s16] ss:$0 sm:$0xff] }
 0x82e   :  { %v2427_v10 = vpop.eup %2426 }
 0x82f   :  { %v986_v14 = vadd.f32 1.0, %v2427_v10 }
 0x831   :  { %v988_v12 = vmul.f32 0.5, %v986_v14 }
 0x833   :  { %v990_v16 = vmul.f32 %v988_v12, %v971_v1 }
 0x835   :  { %v991_v18 = vpack.c.bf16 %v990_v16, %v989_v15 }
 0x837   :  { %2185 = vmatmul.msk.bf16.vlgmr.msrb.gmra.mxu3 %vm1028_vm4, %v991_v18 }
 0x8ba   :  { %v1041_v21 = vpop.f32.mrf.mxu3 }
 0x8bb   :  { %v1042_v13 = vadd.f32 %v2369_v20, %v1041_v21 }
 0x8bd   :  { %v1046_v22 = vadd.f32 %v1042_v13, %v933_v50 }
 0x8bf   :  { %v1050_v24 = vsel %vm131_vm2, %v1046_v22, 0.0 }
 0x8c0   :  { %1051 = vadd.xlane.f32.xlu1 %v1050_v24 }
 0x8c2   :  { %v1043_v25 = vpop.f32.mrf.mxu3 }
 0x8c3   :  { %v1044_v26 = vadd.f32 %v2369_v20, %v1043_v25 }
 0x8c5   :  { %v1047_v27 = vadd.f32 %v1044_v26, %v934_v51 }
 0x8c7   :  { %v1053_v23 = vsel %vm131_vm2, %v1047_v27, 0.0 }
 0x8c8   :  { %1054 = vadd.xlane.f32.xlu2 %v1053_v23 }
 0x933   :  { %v1052_v28 = vpop.xlane.xlu1 %1051 }
 0x934   :  { %v1056_v17 = vmul.f32 %v1052_v28, %v2694_v37 }
 0x936   :  { %v1058_v19 = vsub.f32 %v1046_v22, %v1056_v17 }
 0x938   :  { %v1060_v29 = vmul.f32 %v1058_v19, %v1058_v19 }
 0x93a   :  { %v1062_v30 = vsel %vm131_vm2, %v1060_v29, 0.0 }
 0x93b   :  { %v1055_v31 = vpop.xlane.xlu2 %1054  ;;  %1063 = vadd.xlane.f32.xlu2 %v1062_v30 }
 0x93c   :  { %v1057_v32 = vmul.f32 %v1055_v31, %v2694_v37 }
 0x93e   :  { %v1059_v33 = vsub.f32 %v1047_v27, %v1057_v32 }
 0x940   :  { %v1061_v34 = vmul.f32 %v1059_v33, %v1059_v33 }
 0x942   :  { %v1065_v35 = vsel %vm131_vm2, %v1061_v34, 0.0 }
 0x943   :  { %1066 = vadd.xlane.f32.xlu2 %v1065_v35 }
 0x9ae   :  { %v1064_v39 = vpop.xlane.xlu2 %1063 }
 0x9af   :  { %v1068_v40 = vmul.f32 %v1064_v39, %v2694_v37 }
 0x9b1   :  { %v1070_v41 = vadd.f32 1e-12, %v1068_v40 }
 0x9b3   :  { %2428 = vrsqrt.f32 %v1070_v41  ;;  %vm1078_vm6 = vweird.f32 %v1070_v41 }
 0x9b6   :  { %v1067_v43 = vpop.xlane.xlu2 %1066 }
 0x9b7   :  { %v1069_v45 = vmul.f32 %v1067_v43, %v2694_v37 }
 0x9b9   :  { %v2429_v46 = vpop.eup %2428  ;;  %v1071_v47 = vadd.f32 1e-12, %v1069_v45 }
 0x9ba   :  { %v1073_v48 = vmul.f32 %v2429_v46, %v1070_v41  ;;  %vm1079_vm5 = vweird.f32 %v2429_v46 }
 0x9bb   :  { %2430 = vrsqrt.f32 %v1071_v47  ;;  %vm1080_vm7 = vmor %vm1078_vm6, %vm1079_vm5  ;;  %vm1088_vm9 = vweird.f32 %v1071_v47 }
 0x9bc   :  { %v1074_v49 = vmul.f32 %v2429_v46, %v1073_v48 }
 0x9be   :  { %v1075_v50 = vmul.f32 0.5, %v1074_v49 }
 0x9c0   :  { %v1076_v51 = vsub.f32 1.5, %v1075_v50 }
 0x9c1   :  { %v2431_v52 = vpop.eup %2430 }
 0x9c2   :  { %v1077_v53 = vmul.f32 %v2429_v46, %v1076_v51  ;;  %v1083_v54 = vmul.f32 %v2431_v52, %v1071_v47  ;;  %vm1089_vm8 = vweird.f32 %v2431_v52 }
 0x9c3   :  { %vm1090_vm11 = vmor %vm1088_vm9, %vm1089_vm8  ;;  %vm2030_vm8 = vcmask 1041409  }
 0x9c4   :  { %v1084_v55 = vmul.f32 %v2431_v52, %v1083_v54  ;;  %v1081_v56 = vsel %vm1080_vm7, %v2429_v46, %v1077_v53 }
 0x9c5   :  { %v1092_v60 = vmul.f32 %v1081_v56, %v1058_v19 }
 0x9c6   :  { %v1085_v57 = vmul.f32 0.5, %v1084_v55 }
 0x9c7   :  { %v1097_v0 = vmul.f32 %v2370_v59, %v1092_v60 }
 0x9c8   :  { %v1086_v58 = vsub.f32 1.5, %v1085_v57 }
 0x9c9   :  { %v2926_v3 = vadd.f32 %v2371_v63, %v1097_v0 }
 0x9ca   :  { %v1087_v61 = vmul.f32 %v2431_v52, %v1086_v58 }
 0x9cc   :  { %v1091_v62 = vsel %vm1090_vm11, %v2431_v52, %v1087_v61 }
 0x9cd   :  { %v1093_v1 = vmul.f32 %v1091_v62, %v1059_v33 }
 0x9cf   :  { %v1098_v2 = vmul.f32 %v2370_v59, %v1093_v1 }
 0x9d1   :  { %v2928_v4 = vadd.f32 %v2371_v63, %v1098_v2 }
 0x9d3   :  { %v1104_v5 = vpack.c.bf16 %v2928_v4, %v2926_v3 }
 0x9d5   :  { %2199 = vmatmul.msk.bf16.vlgmr.msrb.gmra.mxu1 %vm131_vm2, %v1104_v5 }
 0xa52   :  { %v1139_v7 = vpop.f32.mrf.mxu1 }
 0xa53   :  { %v2936_v8 = vadd.f32 %v2372_v6, %v1139_v7 }
 0xa55   :  { %1145 = vrot.lane.b32.xlu0 %v2936_v8, %s2508_s5 }
 0xa5a   :  { %v1141_v9 = vpop.f32.mrf.mxu1 }
 0xa5b   :  { %v2940_v10 = vadd.f32 %v2372_v6, %v1141_v9 }
 0xa5d   :  { %1226 = vrot.lane.b32.xlu1 %v2940_v10, %s2510_s17  ;;  %1228 = vrot.lane.b32.xlu2 %v2940_v10, %s2507_s1 }
 0xa5e   :  { %1200 = vrot.lane.b32.xlu0 %v2936_v8, %s2507_s1  ;;  %s3199_s1 = smov 56  }
 0xa65   :  { %1282 = vrot.lane.b32.xlu1 %v2940_v10, %s2511_s6  ;;  %1198 = vrot.lane.b32.xlu2 %v2936_v8, %s2510_s17  ;;  %s3201_s17 = smov 64  }
 0xa66   :  { %1172 = vrot.lane.b32.xlu0 %v2940_v10, %s2508_s5  ;;  %s3200_s5 = smov 48  }
 0xa6d   :  { %1312 = vrot.lane.b32.xlu1 %v2936_v8, %s2512_s26  ;;  %1284 = vrot.lane.b32.xlu2 %v2940_v10, %s3197_s7 }
 0xa6e   :  { %1340 = vrot.lane.b32.xlu0 %v2940_v10, %s2512_s26  ;;  %s2519_s26 = smov [#allocation2]  }
 0xa75   :  { %1338 = vrot.lane.b32.xlu2 %v2940_v10, %s3198_s30 }
 0xa76   :  { %1256 = vrot.lane.b32.xlu0 %v2936_v8, %s3197_s7 }
 0xa7d   :  { %1254 = vrot.lane.b32.xlu2 %v2936_v8, %s2511_s6  ;;  %s3202_s6 = smov 40  }
 0xa7e   :  { %1310 = vrot.lane.b32.xlu0 %v2936_v8, %s3198_s30 }
 0xab7   :  { %v1229_v11 = vpop.permute.xlu2 %1228 }
 0xabf   :  { %v1199_v12 = vpop.permute.xlu2 %1198 }
 0xac7   :  { %v1146_v14 = vpop.permute.xlu0 %1145  ;;  %v1285_v18 = vpop.permute.xlu2 %1284 }
 0xac8   :  { %2200 = vmatpush.xpose.msk.msra.mxu2 %vm239_vm10, %v1146_v14 }
 0xacb   :  { %2201 = vmatmul.msk.f32.vlgmr.msra.gmra.mxu2 %vm239_vm10, %v2936_v8 }
 0xacc   :  { %2206 = vmatpush.xpose.msk.msrb.mxu2 %vm239_vm10, %v1229_v11 }
 0xacf   :  { %v1227_v15 = vpop.permute.xlu1 %1226  ;;  %v1339_v24 = vpop.permute.xlu2 %1338 }
 0xad0   :  { %v1201_v16 = vpop.permute.xlu0 %1200 }
 0xad1   :  { %2204 = vmatpush.xpose.msk.msra.mxu1 %vm239_vm10, %v1201_v16 }
 0xad3   :  { %2207 = vmatmul.msk.f32.vlgmr.msrb.gmra.mxu2 %vm239_vm10, %v1227_v15 }
 0xad4   :  { %2205 = vmatmul.msk.f32.vlgmr.msra.gmra.mxu1 %vm239_vm10, %v1199_v12 }
 0xad7   :  { %v1283_v20 = vpop.permute.xlu1 %1282  ;;  %v1255_v26 = vpop.permute.xlu2 %1254 }
 0xad8   :  { %v1173_v21 = vpop.permute.xlu0 %1172 }
 0xad9   :  { %2202 = vmatpush.xpose.msk.msrb.mxu0 %vm239_vm10, %v1173_v21 }
 0xadc   :  { %2203 = vmatmul.msk.f32.vlgmr.msrb.gmra.mxu0 %vm239_vm10, %v2940_v10 }
 0xadd   :  { %2210 = vmatpush.xpose.msk.msra.mxu0 %vm239_vm10, %v1285_v18 }
 0xadf   :  { %v1313_v13 = vpop.permute.xlu1 %1312 }
 0xae0   :  { %v1341_v22 = vpop.permute.xlu0 %1340  ;;  %2212 = vmatpush.xpose.msk.msrb.mxu1 %vm239_vm10, %v1313_v13 }
 0xae1   :  { %2214 = vmatpush.xpose.msk.msra.mxu2 %vm239_vm10, %v1341_v22 }
 0xae4   :  { %2211 = vmatmul.msk.f32.vlgmr.msra.gmra.mxu0 %vm239_vm10, %v1283_v20  ;;  %2215 = vmatmul.msk.f32.vlgmr.msra.gmra.mxu2 %vm239_vm10, %v1339_v24 }
 0xae8   :  { %v1257_v25 = vpop.permute.xlu0 %1256 }
 0xae9   :  { %2208 = vmatpush.xpose.msk.msra.mxu3 %vm239_vm10, %v1257_v25 }
 0xaec   :  { %2209 = vmatmul.msk.f32.vlgmr.msra.gmra.mxu3 %vm239_vm10, %v1255_v26 }
 0xaf0   :  { %v1311_v27 = vpop.permute.xlu0 %1310 }
 0xaf1   :  { %2213 = vmatmul.msk.f32.vlgmr.msrb.gmra.mxu1 %vm239_vm10, %v1311_v27 }
 0xb4e   :  { %v1168_v23 = vpop.f32.mrf.mxu2 }
 0xb4f   :  { %v1366_v48 = vmul.f32 0.35355338, %v1168_v23 }
 0xb51   :  { %v1223_v28 = vpop.f32.mrf.mxu1  ;;  %v1374_v51 = vadd.f32 %v1366_v48, %v2777_v38 }
 0xb52   :  { %v1367_v17 = vmul.f32 0.35355338, %v1223_v28 }
 0xb53   :  { %v1382_v55 = vsel %vm239_vm10, %v1374_v51, -inf }
 0xb54   :  { %v1375_v19 = vadd.f32 %v1367_v17, %v2777_v38 }
 0xb56   :  { %v1251_v29 = vpop.f32.mrf.mxu2  ;;  %v1385_v30 = vsel %vm239_vm10, %v1375_v19, -inf }
 0xb57   :  { %v1371_v31 = vmul.f32 0.35355338, %v1251_v29  ;;  %1386 = vmax.xlane.f32.xlu2 %v1385_v30 }
 0xb59   :  { %v1379_v32 = vadd.f32 %v1371_v31, %v2781_v44  ;;  %v1195_v52 = vpop.f32.mrf.mxu0 }
 0xb5a   :  { %v1370_v54 = vmul.f32 0.35355338, %v1195_v52  ;;  %v2221_v52 = vld [vmem:[%s3152_s8 + $0x14] sm:$0xf] }
 0xb5b   :  { %v1397_v33 = vsel %vm239_vm10, %v1379_v32, -inf }
 0xb5c   :  { %1398 = vmax.xlane.f32.xlu1 %v1397_v33  ;;  %v1378_v56 = vadd.f32 %v1370_v54, %v2781_v44 }
 0xb5e   :  { %v1394_v59 = vsel %vm239_vm10, %v1378_v56, -inf }
 0xb61   :  { %v1307_v5 = vpop.f32.mrf.mxu0 }
 0xb62   :  { %v1372_v6 = vmul.f32 0.35355338, %v1307_v5 }
 0xb64   :  { %v1380_v7 = vadd.f32 %v1372_v6, %v2781_v44 }
 0xb66   :  { %v1400_v9 = vsel %vm239_vm10, %v1380_v7, -inf }
 0xb67   :  { %v1363_v34 = vpop.f32.mrf.mxu2 }
 0xb68   :  { %v1373_v35 = vmul.f32 0.35355338, %v1363_v34 }
 0xb6a   :  { %v2993_v36 = vadd.f32 %v1373_v35, %v2781_v44  ;;  %v2352_v35 = vpack.i.bf16 %v2940_v10, %v2936_v8 }
 0xb6c   :  { %v1403_v39 = vsel %vm239_vm10, %v2993_v36, -inf }
 0xb6e   :  { %v1335_v57 = vpop.f32.mrf.mxu1 }
 0xb6f   :  { %v1369_v58 = vmul.f32 0.35355338, %v1335_v57  ;;  %v1279_v62 = vpop.f32.mrf.mxu3 }
 0xb70   :  { %v1368_v63 = vmul.f32 0.35355338, %v1279_v62 }
 0xb71   :  { %v3006_v61 = vadd.f32 %v1369_v58, %v2777_v38  ;;  %v1584_v58 = vsel %vm679_vm12, %v2221_v52, 0 }
 0xb72   :  { %v1376_v1 = vadd.f32 %v1368_v63, %v2777_v38 }
 0xb73   :  { %v1391_v0 = vsel %vm239_vm10, %v3006_v61, -inf }
 0xb74   :  { %v1388_v2 = vsel %vm239_vm10, %v1376_v1, -inf }
 0xb75   :  { %1551 = vrot.lane.b32.xlu1 %v2940_v10, %s3199_s1 }
 0xb9f   :  { %1404 = vmax.xlane.f32.xlu1 %v1403_v39 }
 0xbb8   :  { %1646 = vrot.lane.b32.xlu1 %v2940_v10, %s3200_s5 }
 0xbca   :  { %v1387_v40 = vpop.xlane.xlu2 %1386 }
 0xbcb   :  { %v1407_v41 = vsub.f32 %v1375_v19, %v1387_v40 }
 0xbcd   :  { %v1416_v42 = vmul.f32 1.442695, %v1407_v41 }
 0xbcf   :  { %2432 = vpow2.f32 %v1416_v42  ;;  %v1399_v43 = vpop.xlane.xlu1 %1398 }
 0xbd0   :  { %v1411_v45 = vsub.f32 %v1379_v32, %v1399_v43 }
 0xbd2   :  { %v1424_v46 = vmul.f32 1.442695, %v1411_v45 }
 0xbd4   :  { %2434 = vpow2.f32 %v1424_v46 }
 0xbd5   :  { %v2433_v47 = vpop.eup %2432 }
 0xbd6   :  { %v1433_v49 = vsel %vm239_vm10, %v2433_v47, 0.0 }
 0xbd7   :  { %1434 = vadd.xlane.f32.xlu2 %v1433_v49 }
 0xbda   :  { %v2435_v50 = vpop.eup %2434 }
 0xbdb   :  { %v1445_v53 = vsel %vm239_vm10, %v2435_v50, 0.0 }
 0xbdc   :  { %1446 = vadd.xlane.f32.xlu0 %v1445_v53 }
 0xbdf   :  { %1383 = vmax.xlane.f32.xlu2 %v1382_v55 }
 0xbe7   :  { %1395 = vmax.xlane.f32.xlu2 %v1394_v59  ;;  %v1552_v60 = vpop.permute.xlu1 %1551 }
 0xbe8   :  { %1572 = vmatpush.msrb.mxu2 %v1552_v60 }
 0xbef   :  { %1392 = vmax.xlane.f32.xlu2 %v1391_v0 }
 0xbf0   :  { %1525 = vrot.lane.b32.xlu0 %v2936_v8, %s3199_s1 }
 0xbf7   :  { %1389 = vmax.xlane.f32.xlu2 %v1388_v2 }
 0xc12   :  { %v1405_v11 = vpop.xlane.xlu1 %1404 }
 0xc13   :  { %v1413_v31 = vsub.f32 %v2993_v36, %v1405_v11 }
 0xc15   :  { %v1428_v33 = vmul.f32 1.442695, %v1413_v31 }
 0xc1a   :  { %1401 = vmax.xlane.f32.xlu0 %v1400_v9 }
 0xc2a   :  { %v1647_v14 = vpop.permute.xlu1 %1646 }
 0xc2b   :  { %1667 = vmatpush.msra.mxu2 %v1647_v14 }
 0xc4a   :  { %v1435_v12 = vpop.xlane.xlu2 %1434 }
 0xc4f   :  { %v1447_v15 = vpop.xlane.xlu0 %1446 }
 0xc50   :  { %2436 = vrcp.f32 %v1447_v15 }
 0xc52   :  { %v1384_v16 = vpop.xlane.xlu2 %1383 }
 0xc53   :  { %v1406_v18 = vsub.f32 %v1374_v51, %v1384_v16 }
 0xc55   :  { %v1414_v20 = vmul.f32 1.442695, %v1406_v18 }
 0xc56   :  { %v2437_v38 = vpop.eup %2436 }
 0xc57   :  { %v1467_v21 = vmul.f32 %v2437_v38, %v2435_v50  ;;  %2438 = vpow2.f32 %v1414_v20 }
 0xc58   :  { %2440 = vrcp.f32 %v1435_v12 }
 0xc59   :  { %2220 = vmatmul.msk.f32.vlgmr.msrb.gmra.mxu2 %vm239_vm10, %v1467_v21  ;;  %v2218_v21 = vld [vmem:[%s3152_s8 + $0x10] sm:$0xf] }
 0xc5a   :  { %v1396_v13 = vpop.xlane.xlu2 %1395 }
 0xc5b   :  { %v1410_v44 = vsub.f32 %v1378_v56, %v1396_v13  ;;  %v1604_v13 = vsel %vm679_vm12, %v2218_v21, 0 }
 0xc5d   :  { %v2439_v22 = vpop.eup %2438  ;;  %v1422_v24 = vmul.f32 1.442695, %v1410_v44 }
 0xc5e   :  { %v1430_v25 = vsel %vm239_vm10, %v2439_v22, 0.0  ;;  %v2441_v26 = vpop.eup %2440 }
 0xc5f   :  { %2442 = vpow2.f32 %v1422_v24  ;;  %1431 = vadd.xlane.f32.xlu2 %v1430_v25  ;;  %v1463_v27 = vmul.f32 %v2441_v26, %v2433_v47  ;;  %v2230_v25 = vld [vmem:[%s3152_s8 + $0x1c] sm:$0xf] }
 0xc60   :  { %v1756_v26 = vsel %vm679_vm12, %v2230_v25, 0 }
 0xc62   :  { %v1393_v23 = vpop.xlane.xlu2 %1392  ;;  %v1526_v28 = vpop.permute.xlu0 %1525 }
 0xc63   :  { %1546 = vmatpush.msra.mxu1 %v1526_v28  ;;  %v1409_v42 = vsub.f32 %v3006_v61, %v1393_v23 }
 0xc64   :  { %2219 = vmatmul.msk.f32.vlgmr.msra.gmra.mxu1 %vm239_vm10, %v1463_v27  ;;  %v2226_v27 = vld [vmem:[%s3152_s8 + $0x18] sm:$0xf] }
 0xc65   :  { %v2443_v17 = vpop.eup %2442  ;;  %v1420_v46 = vmul.f32 1.442695, %v1409_v42  ;;  %v1679_v23 = vsel %vm679_vm12, %v2226_v27, 0  ;;  %v2373_v42 = vld [vmem:[%s3153_s9 + $0x1] ss:$0 sm:$0xff] }
 0xc66   :  { %v1442_v19 = vsel %vm239_vm10, %v2443_v17, 0.0  ;;  %v2375_v27 = vld [vmem:[%s3155_s11 + $0x1] ss:$0 sm:$0xff] }
 0xc67   :  { %1443 = vadd.xlane.f32.xlu0 %v1442_v19 }
 0xc6a   :  { %v1390_v29 = vpop.xlane.xlu2 %1389 }
 0xc6b   :  { %v1408_v30 = vsub.f32 %v1376_v1, %v1390_v29 }
 0xc6d   :  { %v1418_v32 = vmul.f32 1.442695, %v1408_v30 }
 0xc6f   :  { %2444 = vpow2.f32 %v1418_v32 }
 0xc70   :  { %2446 = vpow2.f32 %v1428_v33 }
 0xc75   :  { %v3021_v34 = vpop.eup %2444 }
 0xc76   :  { %v1436_v39 = vsel %vm239_vm10, %v3021_v34, 0.0  ;;  %v2447_v40 = vpop.eup %2446 }
 0xc77   :  { %2353 = vrot.lane.b32.xlu2 %v2352_v35, %s3201_s17  ;;  %1437 = vadd.xlane.f32.xlu0 %v1436_v39  ;;  %v1451_v41 = vsel %vm239_vm10, %v2447_v40, 0.0 }
 0xc7f   :  { %1452 = vadd.xlane.f32.xlu0 %v1451_v41 }
 0xc8d   :  { %v1402_v36 = vpop.xlane.xlu0 %1401 }
 0xc8e   :  { %v1412_v43 = vsub.f32 %v1380_v7, %v1402_v36 }
 0xc90   :  { %v1426_v45 = vmul.f32 1.442695, %v1412_v43 }
 0xc92   :  { %2448 = vpow2.f32 %v1426_v45 }
 0xc93   :  { %2358 = vrot.lane.b32.xlu0 %v2352_v35, %s3202_s6  ;;  %2450 = vpow2.f32 %v1420_v46 }
 0xc98   :  { %v2449_v10 = vpop.eup %2448 }
 0xc99   :  { %v1448_v47 = vsel %vm239_vm10, %v2449_v10, 0.0  ;;  %v2451_v48 = vpop.eup %2450 }
 0xc9a   :  { %1449 = vadd.xlane.f32.xlu1 %v1448_v47  ;;  %v1439_v49 = vsel %vm239_vm10, %v2451_v48, 0.0 }
 0xca0   :  { %1440 = vadd.xlane.f32.xlu2 %v1439_v49 }
 0xcb3   :  { %1620 = vrot.lane.b32.xlu1 %v2936_v8, %s3200_s5 }
 0xcd2   :  { %v1432_v50 = vpop.xlane.xlu2 %1431 }
 0xcd3   :  { %2452 = vrcp.f32 %v1432_v50 }
 0xcd9   :  { %v2453_v51 = vpop.eup %2452 }
 0xcda   :  { %v2354_v53 = vpop.permute.xlu2 %2353  ;;  %v1444_v54 = vpop.xlane.xlu0 %1443  ;;  %v1462_v57 = vmul.f32 %v2453_v51, %v2439_v22 }
 0xcdb   :  { %v2356_v55 = vunpack.i.h.bf16 %v2354_v53  ;;  %v2355_v56 = vunpack.i.l.bf16 %v2354_v53  ;;  %2454 = vrcp.f32 %v1444_v54 }
 0xcdc   :  { %v1574_v59 = vpop.f32.mrf.mxu2 }
 0xcdd   :  { %1491 = vmatpush.msrb.mxu3 %v2355_v56  ;;  %1517 = vmatpush.msrb.mxu0 %v2356_v55 }
 0xcde   :  { %2216 = vmatmul.msk.f32.vlgmr.msrb.gmra.mxu3 %vm239_vm10, %v1462_v57 }
 0xcdf   :  { %1593 = vmatpush.bf16.msra.mxu3 %v1584_v58  ;;  %1613 = vmatpush.bf16.msra.mxu0 %v1604_v13 }
 0xce1   :  { %v2455_v8 = vpop.eup %2454  ;;  %v1548_v60 = vpop.f32.mrf.mxu1 }
 0xce2   :  { %v1466_v61 = vmul.f32 %v2455_v8, %v2443_v17  ;;  %v1577_v62 = vpack.c.bf16 %v1574_v59, %v1548_v60 }
 0xce4   :  { %2217 = vmatmul.msk.f32.vlgmr.msrb.gmra.mxu0 %vm239_vm10, %v1466_v61 }
 0xce5   :  { %1765 = vmatpush.bf16.msrb.mxu0 %v1756_v26 }
 0xce6   :  { %2222 = vmatmul.msk.bf16.vlgmr.msra.gmra.mxu3 %vm239_vm10, %v1577_v62 }
 0xcea   :  { %v1438_v63 = vpop.xlane.xlu0 %1437 }
 0xcf2   :  { %v1453_v0 = vpop.xlane.xlu0 %1452 }
 0xcf3   :  { %2456 = vrcp.f32 %v1453_v0 }
 0xcf9   :  { %v2457_v1 = vpop.eup %2456 }
 0xcfa   :  { %v1469_v7 = vmul.f32 %v2457_v1, %v2447_v40 }
 0xd05   :  { %v2359_v2 = vpop.permute.xlu0 %2358 }
 0xd06   :  { %v2361_v5 = vunpack.i.h.bf16 %v2359_v2  ;;  %v2360_v6 = vunpack.i.l.bf16 %v2359_v2  ;;  %v2305_v2 = vld [vmem:[%s3156_s12 + $0x10] sm:$0xff] }
 0xd08   :  { %1718 = vmatpush.msrb.mxu2 %v2360_v6  ;;  %1744 = vmatpush.msrb.mxu3 %v2361_v5 }
 0xd09   :  { %2229 = vmatmul.msk.f32.vlgmr.msrb.gmra.mxu3 %vm239_vm10, %v1469_v7 }
 0xd0d   :  { %v1450_v9 = vpop.xlane.xlu1 %1449 }
 0xd0e   :  { %2458 = vrcp.f32 %v1450_v9 }
 0xd13   :  { %v1441_v11 = vpop.xlane.xlu2 %1440 }
 0xd14   :  { %v2459_v14 = vpop.eup %2458  ;;  %2460 = vrcp.f32 %v1441_v11 }
 0xd15   :  { %v1468_v12 = vmul.f32 %v2459_v14, %v2449_v10  ;;  %2462 = vrcp.f32 %v1438_v63 }
 0xd17   :  { %2225 = vmatmul.msk.f32.vlgmr.msra.gmra.mxu2 %vm239_vm10, %v1468_v12 }
 0xd1a   :  { %v2461_v15 = vpop.eup %2460 }
 0xd1b   :  { %v1465_v16 = vmul.f32 %v2461_v15, %v2451_v48  ;;  %v2463_v18 = vpop.eup %2462 }
 0xd1c   :  { %v1464_v20 = vmul.f32 %v2463_v18, %v3021_v34 }
 0xd1f   :  { %2228 = vmatmul.msk.f32.vlgmr.msrb.gmra.mxu2 %vm239_vm10, %v1465_v16 }
 0xd25   :  { %v1621_v38 = vpop.permute.xlu1 %1620 }
 0xd26   :  { %1641 = vmatpush.msrb.mxu1 %v1621_v38 }
 0xd27   :  { %2224 = vmatmul.msk.f32.vlgmr.msrb.gmra.mxu1 %vm239_vm10, %v1464_v20 }
 0xd28   :  { %1688 = vmatpush.bf16.msra.mxu1 %v1679_v23 }
 0xd61   :  { %v1493_v44 = vpop.f32.mrf.mxu3  ;;  %v1519_v22 = vpop.f32.mrf.mxu0 }
 0xd62   :  { %v1522_v24 = vpack.c.bf16 %v1519_v22, %v1493_v44  ;;  %v2374_v22 = vld [vmem:[%s3154_s10 + $0x1] ss:$0 sm:$0xff]  ;;  %s2105_s10 = sshll.u32 %s2519_s26, 4  ;;  %s2106_s10 = int_to_ptr.vmem [resolvable:$true] %s2105_s10 }
 0xd64   :  { %2223 = vmatmul.msk.bf16.vlgmr.msra.gmra.mxu0 %vm239_vm10, %v1522_v24 }
 0xd69   :  { %v1595_v28 = vpop.f32.mrf.mxu3 }
 0xd71   :  { %v1597_v17 = vpop.f32.mrf.mxu3 }
 0xd8c   :  { %v1746_v29 = vpop.f32.mrf.mxu3 }
 0xd9a   :  { %v1669_v19 = vpop.f32.mrf.mxu2 }
 0xda2   :  { %v1720_v30 = vpop.f32.mrf.mxu2 }
 0xda3   :  { %v1749_v31 = vpack.c.bf16 %v1746_v29, %v1720_v30 }
 0xda4   :  { %v1643_v32 = vpop.f32.mrf.mxu1 }
 0xda5   :  { %v1672_v33 = vpack.c.bf16 %v1669_v19, %v1643_v32  ;;  %2231 = vmatmul.msk.bf16.vlgmr.msrb.gmra.mxu0 %vm239_vm10, %v1749_v31  ;;  %v2310_v31 = vld [vmem:[%s3158_s14 + $0x38] sm:$0xff]  ;;  %v2309_v32 = vld [vmem:[%s3158_s14 + $0x30] sm:$0xff] }
 0xda6   :  { %1945 = vmatpush.bf16.msrb.mxu1 %v2310_v31  ;;  %v2378_v31 = vld [vmem:[%s3160_s16 + $0x1] ss:$0 sm:$0xff] }
 0xda7   :  { %2227 = vmatmul.msk.bf16.vlgmr.msra.gmra.mxu1 %vm239_vm10, %v1672_v33  ;;  %v2308_v33 = vld [vmem:[%s3158_s14 + $0x28] sm:$0xff] }
 0xdaa   :  { %1946 = vmatpush.bf16.msrb.mxu1 %v2309_v32 }
 0xdae   :  { %1947 = vmatpush.bf16.msrb.mxu1 %v2308_v33  ;;  %v2379_v33 = vld [vmem:[%s3196_s29 + $0x1] ss:$0 sm:$0xff] }
 0xde1   :  { %v1615_v34 = vpop.f32.mrf.mxu0 }
 0xde2   :  { %v1616_v39 = vadd.f32 %v1615_v34, %v1595_v28  ;;  %v2376_v34 = vld [vmem:[%s3157_s13 + $0x1] ss:$0 sm:$0xff] }
 0xde9   :  { %v1617_v35 = vpop.f32.mrf.mxu0 }
 0xdea   :  { %v1618_v46 = vadd.f32 %v1617_v35, %v1597_v17 }
 0xe22   :  { %v1767_v40 = vpop.f32.mrf.mxu0 }
 0xe24   :  { %v1690_v41 = vpop.f32.mrf.mxu1 }
 0xe25   :  { %v1695_v36 = vadd.f32 %v1690_v41, %v1616_v39  ;;  %v2307_v39 = vld [vmem:[%s3158_s14 + $0x20] sm:$0xff] }
 0xe26   :  { %1948 = vmatpush.bf16.msrb.mxu1 %v2307_v39 }
 0xe27   :  { %v1772_v43 = vadd.f32 %v1767_v40, %v1695_v36 }
 0xe29   :  { %v1779_v45 = vadd.f32 %v2373_v42, %v1772_v43 }
 0xe2a   :  { %v1769_v50 = vpop.f32.mrf.mxu0 }
 0xe2b   :  { %v1781_v10 = vadd.f32 %v1779_v45, %v2926_v3 }
 0xe2c   :  { %v1692_v47 = vpop.f32.mrf.mxu1 }
 0xe2d   :  { %v1696_v48 = vadd.f32 %v1692_v47, %v1618_v46  ;;  %v1787_v49 = vsel %vm131_vm2, %v1781_v10, 0.0 }
 0xe2e   :  { %1788 = vadd.xlane.f32.xlu0 %v1787_v49 }
 0xe2f   :  { %v1773_v51 = vadd.f32 %v1769_v50, %v1696_v48 }
 0xe31   :  { %v1780_v52 = vadd.f32 %v2373_v42, %v1773_v51 }
 0xe33   :  { %v1782_v53 = vadd.f32 %v1780_v52, %v2928_v4  ;;  %v2306_v4 = vld [vmem:[%s3156_s12 + $0x18] sm:$0xff] }
 0xe34   :  { %1873 = vmatpush.bf16.msra.mxu2 %v2306_v4 }
 0xe35   :  { %v1790_v54 = vsel %vm131_vm2, %v1782_v53, 0.0 }
 0xe36   :  { %1791 = vadd.xlane.f32.xlu1 %v1790_v54 }
 0xe38   :  { %1874 = vmatpush.bf16.msra.mxu2 %v2305_v2 }
 0xea1   :  { %v1789_v55 = vpop.xlane.xlu0 %1788 }
 0xea2   :  { %v1793_v56 = vmul.f32 %v1789_v55, %v2694_v37 }
 0xea4   :  { %v1795_v57 = vsub.f32 %v1781_v10, %v1793_v56 }
 0xea6   :  { %v1797_v58 = vmul.f32 %v1795_v57, %v1795_v57 }
 0xea8   :  { %v1799_v3 = vsel %vm131_vm2, %v1797_v58, 0.0 }
 0xea9   :  { %1800 = vadd.xlane.f32.xlu2 %v1799_v3  ;;  %v1792_v8 = vpop.xlane.xlu1 %1791 }
 0xeaa   :  { %v1794_v59 = vmul.f32 %v1792_v8, %v2694_v37 }
 0xeac   :  { %v1796_v60 = vsub.f32 %v1782_v53, %v1794_v59 }
 0xeae   :  { %v1798_v61 = vmul.f32 %v1796_v60, %v1796_v60 }
 0xeb0   :  { %v1802_v62 = vsel %vm131_vm2, %v1798_v61, 0.0 }
 0xeb1   :  { %1803 = vadd.xlane.f32.xlu2 %v1802_v62 }
 0xf1c   :  { %v1801_v63 = vpop.xlane.xlu2 %1800 }
 0xf1d   :  { %v1805_v0 = vmul.f32 %v1801_v63, %v2694_v37 }
 0xf1f   :  { %v1807_v1 = vadd.f32 1e-12, %v1805_v0 }
 0xf21   :  { %2464 = vrsqrt.f32 %v1807_v1  ;;  %vm1815_vm12 = vweird.f32 %v1807_v1 }
 0xf24   :  { %v1804_v5 = vpop.xlane.xlu2 %1803 }
 0xf25   :  { %v1806_v6 = vmul.f32 %v1804_v5, %v2694_v37 }
 0xf27   :  { %v2465_v7 = vpop.eup %2464  ;;  %v1808_v9 = vadd.f32 1e-12, %v1806_v6 }
 0xf28   :  { %v1810_v11 = vmul.f32 %v2465_v7, %v1807_v1  ;;  %vm1816_vm10 = vweird.f32 %v2465_v7 }
 0xf29   :  { %2466 = vrsqrt.f32 %v1808_v9  ;;  %vm1817_vm13 = vmor %vm1815_vm12, %vm1816_vm10  ;;  %vm1825_vm15 = vweird.f32 %v1808_v9 }
 0xf2a   :  { %v1811_v14 = vmul.f32 %v2465_v7, %v1810_v11 }
 0xf2c   :  { %v1812_v12 = vmul.f32 0.5, %v1811_v14 }
 0xf2e   :  { %v1813_v15 = vsub.f32 1.5, %v1812_v12 }
 0xf2f   :  { %v2467_v16 = vpop.eup %2466 }
 0xf30   :  { %v1814_v18 = vmul.f32 %v2465_v7, %v1813_v15  ;;  %v1820_v20 = vmul.f32 %v2467_v16, %v1808_v9  ;;  %vm1826_vm14 = vweird.f32 %v2467_v16 }
 0xf31   :  { %vm1827_vm0 = vmor %vm1825_vm15, %vm1826_vm14 }
 0xf32   :  { %v1821_v38 = vmul.f32 %v2467_v16, %v1820_v20  ;;  %v1818_v21 = vsel %vm1817_vm13, %v2465_v7, %v1814_v18 }
 0xf33   :  { %v1829_v24 = vmul.f32 %v1818_v21, %v1795_v57 }
 0xf34   :  { %v1822_v13 = vmul.f32 0.5, %v1821_v38 }
 0xf35   :  { %v1834_v23 = vmul.f32 %v2374_v22, %v1829_v24 }
 0xf36   :  { %v1823_v44 = vsub.f32 1.5, %v1822_v13  ;;  %v2312_v13 = vld [vmem:[%s3162_s18 + $0x8] sm:$0xff] }
 0xf37   :  { %v1839_v19 = vadd.f32 %v2375_v27, %v1834_v23  ;;  %2054 = vmatpush.bf16.msra.mxu3 %v2312_v13 }
 0xf38   :  { %v1824_v25 = vmul.f32 %v2467_v16, %v1823_v44  ;;  %v2311_v44 = vld [vmem:[%s3162_s18] sm:$0xff] }
 0xf3a   :  { %v1828_v26 = vsel %vm1827_vm0, %v2467_v16, %v1824_v25 }
 0xf3b   :  { %v1830_v28 = vmul.f32 %v1828_v26, %v1796_v60  ;;  %v2377_v60 = vld [vmem:[%s3159_s15 + $0x1] ss:$0 sm:$0xff]  ;;  %2055 = vmatpush.bf16.msra.mxu3 %v2311_v44 }
 0xf3d   :  { %v1835_v17 = vmul.f32 %v2374_v22, %v1830_v28 }
 0xf3f   :  { %v1840_v29 = vadd.f32 %v2375_v27, %v1835_v17 }
 0xf41   :  { %v1841_v30 = vpack.c.bf16 %v1840_v29, %v1839_v19 }
 0xf43   :  { %2248 = vmatmul.msk.bf16.vlgmr.msra.gmra.mxu2 %vm131_vm2, %v1841_v30 }
 0xfc6   :  { %v1876_v35 = vpop.f32.mrf.mxu2 }
 0xfc7   :  { %v1877_v40 = vadd.f32 %v2376_v34, %v1876_v35 }
 0xfc9   :  { %v1881_v41 = vmul.f32 %v1877_v40, %v1877_v40 }
 0xfcb   :  { %v1883_v36 = vmul.f32 %v1881_v41, %v1877_v40 }
 0xfcd   :  { %v1885_v42 = vmul.f32 0.044715, %v1883_v36 }
 0xfce   :  { %v1878_v43 = vpop.f32.mrf.mxu2 }
 0xfcf   :  { %v1887_v45 = vadd.f32 %v1885_v42, %v1877_v40  ;;  %v1879_v46 = vadd.f32 %v2376_v34, %v1878_v43 }
 0xfd1   :  { %v1889_v10 = vmul.f32 0.7978846, %v1887_v45  ;;  %v1882_v47 = vmul.f32 %v1879_v46, %v1879_v46 }
 0xfd3   :  { %v1884_v48 = vmul.f32 %v1882_v47, %v1879_v46  ;;  %2468 = vtanh.f32 %v1889_v10 }
 0xfd5   :  { %v1886_v49 = vmul.f32 0.044715, %v1884_v48 }
 0xfd7   :  { %v1888_v50 = vadd.f32 %v1886_v49, %v1879_v46 }
 0xfd9   :  { %v1890_v51 = vmul.f32 0.7978846, %v1888_v50  ;;  %v2469_v52 = vpop.eup %2468 }
 0xfda   :  { %v1893_v53 = vadd.f32 1.0, %v2469_v52 }
 0xfdb   :  { %2470 = vtanh.f32 %v1890_v51 }
 0xfdc   :  { %v1895_v55 = vmul.f32 0.5, %v1893_v53  ;;  %v2314_v53 = vld [vmem:[%s3164_s20 + $0x8] sm:$0xff] }
 0xfdd   :  { %2092 = vmatpush.bf16.msra.mxu0 %v2314_v53 }
 0xfde   :  { %v1897_v58 = vmul.f32 %v1895_v55, %v1877_v40  ;;  %v2380_v55 = vld [vmem:[%s3163_s19] ss:$0 sm:$0xff] }
 0xfe1   :  { %v2471_v54 = vpop.eup %2470 }
 0xfe2   :  { %v1894_v56 = vadd.f32 1.0, %v2471_v54  ;;  %v2313_v54 = vld [vmem:[%s3164_s20] sm:$0xff] }
 0xfe3   :  { %2093 = vmatpush.bf16.msra.mxu0 %v2313_v54 }
 0xfe4   :  { %v1896_v57 = vmul.f32 0.5, %v1894_v56 }
 0xfe6   :  { %v1898_v3 = vmul.f32 %v1896_v57, %v1879_v46 }
 0xfe8   :  { %v1899_v8 = vpack.c.bf16 %v1898_v3, %v1897_v58 }
 0xfea   :  { %2274 = vmatmul.msk.bf16.vlgmr.msrb.gmra.mxu1 %vm1028_vm4, %v1899_v8 }
0x1067   :  { %v1950_v59 = vpop.f32.mrf.mxu1 }
0x1068   :  { %v1951_v63 = vadd.f32 %v2377_v60, %v1950_v59  ;;  %v2381_v59 = vld [vmem:[%s3165_s21] ss:$0 sm:$0xff] }
0x106a   :  { %v1955_v1 = vadd.f32 %v1951_v63, %v1839_v19 }
0x106c   :  { %v1961_v2 = vsel %vm131_vm2, %v1955_v1, 0.0 }
0x106f   :  { %v1952_v61 = vpop.f32.mrf.mxu1 }
0x1070   :  { %v1953_v62 = vadd.f32 %v2377_v60, %v1952_v61 }
0x1072   :  { %v1956_v4 = vadd.f32 %v1953_v62, %v1840_v29 }
0x1074   :  { %v1964_v0 = vsel %vm131_vm2, %v1956_v4, 0.0 }
0x1075   :  { %1965 = vadd.xlane.f32.xlu2 %v1964_v0 }
0x107d   :  { %1962 = vadd.xlane.f32.xlu2 %v1961_v2 }
0x10e8   :  { %v1966_v5 = vpop.xlane.xlu2 %1965 }
0x10e9   :  { %v1968_v6 = vmul.f32 %v1966_v5, %v2694_v37 }
0x10eb   :  { %v1970_v7 = vsub.f32 %v1956_v4, %v1968_v6 }
0x10ed   :  { %v1972_v9 = vmul.f32 %v1970_v7, %v1970_v7 }
0x10ef   :  { %v1976_v11 = vsel %vm131_vm2, %v1972_v9, 0.0 }
0x10f0   :  { %1977 = vadd.xlane.f32.xlu2 %v1976_v11  ;;  %v1963_v14 = vpop.xlane.xlu2 %1962 }
0x10f1   :  { %v1967_v12 = vmul.f32 %v1963_v14, %v2694_v37 }
0x10f3   :  { %v1969_v15 = vsub.f32 %v1955_v1, %v1967_v12 }
0x10f5   :  { %v1971_v16 = vmul.f32 %v1969_v15, %v1969_v15 }
0x10f7   :  { %v1973_v18 = vsel %vm131_vm2, %v1971_v16, 0.0 }
0x10f8   :  { %1974 = vadd.xlane.f32.xlu0 %v1973_v18 }
0x1163   :  { %v1978_v20 = vpop.xlane.xlu2 %1977 }
0x1164   :  { %v1980_v38 = vmul.f32 %v1978_v20, %v2694_v37 }
0x1166   :  { %v1982_v21 = vadd.f32 1e-12, %v1980_v38 }
0x1168   :  { %2472 = vrsqrt.f32 %v1982_v21  ;;  %vm1999_vm3 = vweird.f32 %v1982_v21 }
0x116b   :  { %v1975_v22 = vpop.xlane.xlu0 %1974 }
0x116c   :  { %v1979_v24 = vmul.f32 %v1975_v22, %v2694_v37 }
0x116e   :  { %v2473_v25 = vpop.eup %2472  ;;  %v1981_v26 = vadd.f32 1e-12, %v1979_v24 }
0x116f   :  { %v1994_v27 = vmul.f32 %v2473_v25, %v1982_v21  ;;  %vm2000_vm1 = vweird.f32 %v2473_v25 }
0x1170   :  { %2474 = vrsqrt.f32 %v1981_v26  ;;  %vm2001_vm4 = vmor %vm1999_vm3, %vm2000_vm1  ;;  %vm1989_vm6 = vweird.f32 %v1981_v26 }
0x1171   :  { %v1995_v23 = vmul.f32 %v2473_v25, %v1994_v27 }
0x1173   :  { %v1996_v28 = vmul.f32 0.5, %v1995_v23 }
0x1175   :  { %v1997_v17 = vsub.f32 1.5, %v1996_v28 }
0x1176   :  { %v2475_v19 = vpop.eup %2474 }
0x1177   :  { %v1998_v29 = vmul.f32 %v2473_v25, %v1997_v17  ;;  %v1984_v30 = vmul.f32 %v2475_v19, %v1981_v26  ;;  %vm1990_vm5 = vweird.f32 %v2475_v19 }
0x1178   :  { %vm1991_vm7 = vmor %vm1989_vm6, %vm1990_vm5 }
0x1179   :  { %v2002_v32 = vsel %vm2001_vm4, %v2473_v25, %v1998_v29  ;;  %v1985_v37 = vmul.f32 %v2475_v19, %v1984_v30 }
0x117a   :  { %v2004_v34 = vmul.f32 %v2002_v32, %v1970_v7 }
0x117b   :  { %v1986_v35 = vmul.f32 0.5, %v1985_v37 }
0x117c   :  { %v2009_v39 = vmul.f32 %v2378_v31, %v2004_v34 }
0x117d   :  { %v1987_v40 = vsub.f32 1.5, %v1986_v35 }
0x117e   :  { %v2014_v41 = vadd.f32 %v2379_v33, %v2009_v39 }
0x117f   :  { %v1988_v36 = vmul.f32 %v2475_v19, %v1987_v40 }
0x1180   :  { %v2016_v43 = vpack.c.bf16 %v2014_v41, %v2014_v41 }
0x1181   :  { %v1992_v42 = vsel %vm1991_vm7, %v2475_v19, %v1988_v36 }
0x1182   :  { %v2003_v45 = vmul.f32 %v1992_v42, %v1969_v15  ;;  %v2028_v10 = vunpack.c.l.b16 %v2016_v43 }
0x1184   :  { %v2008_v46 = vmul.f32 %v2378_v31, %v2003_v45  ;;  %v2029_v49 = vrot.slane %v2028_v10, 7 }
0x1186   :  { %v2013_v47 = vadd.f32 %v2379_v33, %v2008_v46 }
0x1188   :  { %v2015_v48 = vpack.c.bf16 %v2013_v47, %v2013_v47 }
0x118a   :  { %v2027_v50 = vunpack.c.l.b16 %v2015_v48 }
0x118c   :  { %v2031_v51 = vsel %vm2030_vm8, %v2029_v49, %v2027_v50 }
0x118d   :  { %v2032_v52 = vpack.c.b16 %v2031_v51, %v2031_v51 }
0x118f   :  { %2285 = vmatmul.msk.bf16.vlgmr.msra.gmra.mxu3 %vm131_vm2, %v2032_v52 }
0x1212   :  { %v2057_v56 = vpop.f32.mrf.mxu3 }
0x1213   :  { %v2058_v57 = vadd.f32 %v2380_v55, %v2057_v56 }
0x1215   :  { %2476 = vtanh.f32 %v2058_v57 }
0x121a   :  { %v2059_v58 = vpop.f32.mrf.mxu3 }
0x121b   :  { %v2477_v3 = vpop.eup %2476 }
0x121c   :  { %v2062_v8 = vpack.c.bf16 %v2477_v3, %v2477_v3 }
0x121e   :  { %2294 = vmatmul.msk.bf16.vlgmr.msra.gmra.mxu0 %vm131_vm2, %v2062_v8 }
0x129b   :  { %v2095_v60 = vpop.f32.mrf.mxu0 }
0x129c   :  { %v2096_v61 = vadd.f32 %v2381_v59, %v2095_v60 }
0x129e   :  { %2099 = vst [vmem:[#allocation2] sm:$0x3] %v2096_v61 }
0x129f   :  { %2110 = dma.vmem_to_hbm [thread:$0]  %s2106_s10, 32, %s2108_s0, [#allocation3]  }
0x12a3   :  { %v2097_v62 = vpop.f32.mrf.mxu0 }
0x12a4   :  { %2502 = dma.done.wait [#allocation3], 32  }
0x12a5   :  { %2503 = vsyncadd [#allocation3], 4294967264 }
0x12a6   :  { %2115 = vsyncpa [#allocation3], 1 }

</bundles_post_ra>
